<compile_context>
chip_gen: v5e
topology: v5e:2x2
jax: 0.10.0
libtpu: 0.0.40
codegen_flags: <defaults>
</compile_context>

<pallas_src>
import jax
import jax.numpy as jnp
from jax.experimental import pallas as pl
from jax.experimental.pallas import tpu as pltpu

# ---- small, module-consistent sizes ---------------------------------------
NUM_UNROLL = 2     # module script default is 4; kept small & consistent
BATCH      = 8     # batch rows map to sublanes (whole batch in one invocation)
INPUT_SIZE = 256   # D (module script uses N*200*2 = 1200; scaled down, lane-aligned)
FC_SIZE    = 128   # F
EPS        = 1e-5  # nn.BatchNorm1d default eps

# ---- row indices into the packed per-feature vector tables ------------------
# vecD : (N_VEC_D, INPUT_SIZE) f32
_BNIN_G  = 0
_BNIN_B  = 1
_ING     = 2
_INBETA  = 2 + NUM_UNROLL
_INB2    = 2 + 2 * NUM_UNROLL
_IMDG    = 2 + 3 * NUM_UNROLL
_IMDBETA = 3 + 3 * NUM_UNROLL
N_VEC_D  = 4 + 3 * NUM_UNROLL
# vecF : (N_VEC_F, FC_SIZE) f32
_IMDB    = 0
_OUTG    = 1
_OUTBETA = 1 + NUM_UNROLL
_OUTB2   = 1 + 2 * NUM_UNROLL
_FCOUT_B = 1 + 3 * NUM_UNROLL
N_VEC_F  = 2 + 3 * NUM_UNROLL

PARAM_ORDER = ["fcin_W", "inW1", "inW2", "imdW1", "imdW_cat",
               "outW1", "outW2", "fcout_W", "vecD", "vecF"]


# ---- math helpers (shared by the kernel and the pure-JAX reference) ---------
def _matmul(x, w):
    # bf16 operands feed the MXU; accumulate in f32.
    return jnp.dot(x.astype(jnp.bfloat16), w, preferred_element_type=jnp.float32)


def _bn_train(x, gamma, beta):
    # Training-mode BatchNorm1d folded into one scale/shift FMA:
    #   (x - mu) * (gamma * rsqrt(var + eps)) + beta
    mu = jnp.mean(x, axis=0, keepdims=True)
    xc = x - mu
    var = jnp.mean(xc * xc, axis=0, keepdims=True)
    return xc * (gamma * jax.lax.rsqrt(var + EPS)) + beta


def _relu(x):
    return jnp.maximum(x, 0.0)


def _forward(x, fcin_W, inW1, inW2, imdW1, imdW_cat,
             outW1, outW2, fcout_W, vecD, vecF):
    """Works on either Pallas Refs (in-kernel) or plain arrays (reference)."""
    gD = lambda i: vecD[i:i + 1, :]
    gF = lambda i: vecF[i:i + 1, :]

    # GetResNet.l_fc_in (bias dropped: cancelled by BN) + l_bn_in
    x = _bn_train(_matmul(x, fcin_W[...]), gD(_BNIN_G), gD(_BNIN_B))

    # BuildResNetUnrollNet.l_ResNets_in : NUM_UNROLL x BuildResNetStack(D)
    for l in range(NUM_UNROLL):
        h = _relu(_bn_train(_matmul(x, inW1[l]), gD(_ING + l), gD(_INBETA + l)))
        x = _relu(x + _matmul(h, inW2[l]) + gD(_INB2 + l))

    # BuildResNetStackInterm(D, F): fc_out[1](x) + fc_out[0](h) fused into a
    # single (B, 2D) x (2D, F) matmul (skip-path weight is rows [:D]).
    h = _relu(_bn_train(_matmul(x, imdW1[...]), gD(_IMDG), gD(_IMDBETA)))
    xh = jnp.concatenate([x, h], axis=1)
    x = _relu(_matmul(xh, imdW_cat[...]) + gF(_IMDB))

    # BuildResNetUnrollNet.l_ResNets_out : NUM_UNROLL x BuildResNetStack(F)
    for l in range(NUM_UNROLL):
        h = _relu(_bn_train(_matmul(x, outW1[l]), gF(_OUTG + l), gF(_OUTBETA + l)))
        x = _relu(x + _matmul(h, outW2[l]) + gF(_OUTB2 + l))

    # GetResNet.l_fc_out
    return _matmul(x, fcout_W[...]) + gF(_FCOUT_B)


# ---- the fused Pallas kernel -------------------------------------------------
def resnet_kernel(x_ref, fcin_W, inW1, inW2, imdW1, imdW_cat,
                  outW1, outW2, fcout_W, vecD, vecF, o_ref):
    o_ref[...] = _forward(x_ref[...], fcin_W, inW1, inW2, imdW1, imdW_cat,
                          outW1, outW2, fcout_W, vecD, vecF)


def _cost_estimate(batch, args, out_bytes):
    D, F, NU = INPUT_SIZE, FC_SIZE, NUM_UNROLL
    flops = 2 * batch * ((2 + 2 * NU) * D * D      # fc_in, in-stacks, interm fc_in
                         + 2 * D * F               # fused interm fc_out
                         + (1 + 2 * NU) * F * F)   # out-stacks, fc_out
    transcendentals = (2 + NU) * D + NU * F        # rsqrt per BN feature
    bytes_accessed = sum(int(a.size) * a.dtype.itemsize for a in args) + out_bytes
    return pl.CostEstimate(flops=flops, transcendentals=transcendentals,
                           bytes_accessed=bytes_accessed)


def get_resnet_forward(x, params):
    flat = [params[k] for k in PARAM_ORDER]
    vmem = pl.BlockSpec(memory_space=pltpu.MemorySpace.VMEM)
    return pl.pallas_call(
        resnet_kernel,
        out_shape=jax.ShapeDtypeStruct((x.shape[0], FC_SIZE), jnp.float32),
        in_specs=[vmem] * (1 + len(flat)),
        out_specs=vmem,
        cost_estimate=_cost_estimate(x.shape[0], [x, *flat],
                                     x.shape[0] * FC_SIZE * 4),
    )(x, *flat)


# ---- deterministic parameter initialization ---------------------------------
def init_params(key):
    keys = iter(jax.random.split(key, 32))
    D, F, NU = INPUT_SIZE, FC_SIZE, NUM_UNROLL

    def mat(in_dim, out_dim, stack=None):
        shape = (in_dim, out_dim) if stack is None else (stack, in_dim, out_dim)
        s = 1.0 / float(in_dim) ** 0.5
        w = jax.random.uniform(next(keys), shape, jnp.float32, -s, s)
        return w.astype(jnp.bfloat16)          # MXU-native weight storage

    def bias(in_dim, dim):
        s = 1.0 / float(in_dim) ** 0.5
        return jax.random.uniform(next(keys), (dim,), jnp.float32, -s, s)

    ones = lambda d: jnp.ones((d,), jnp.float32)
    zeros = lambda d: jnp.zeros((d,), jnp.float32)

    p = {}
    p["fcin_W"] = mat(D, D)                    # l_fc_in   (bias dropped, feeds BN)
    p["inW1"] = mat(D, D, stack=NU)            # in-stack fc_in  (bias dropped)
    p["inW2"] = mat(D, D, stack=NU)            # in-stack fc_out
    p["imdW1"] = mat(D, D)                     # interm fc_in    (bias dropped)
    w_skip = mat(D, F)                         # interm fc_out[1] (applied to block input x)
    w_branch = mat(D, F)                       # interm fc_out[0] (applied to branch h)
    p["imdW_cat"] = jnp.concatenate([w_skip, w_branch], axis=0)   # (2D, F)
    p["outW1"] = mat(F, F, stack=NU)           # out-stack fc_in (bias dropped)
    p["outW2"] = mat(F, F, stack=NU)           # out-stack fc_out
    p["fcout_W"] = mat(F, F)                   # l_fc_out

    # Packed per-feature parameter tables (kept in f32 for BN/bias math).
    rows_d = [ones(D), zeros(D)]                      # l_bn_in gamma / beta
    rows_d += [ones(D) for _ in range(NU)]            # in-stack BN gammas
    rows_d += [zeros(D) for _ in range(NU)]           # in-stack BN betas
    rows_d += [bias(D, D) for _ in range(NU)]         # in-stack fc_out biases
    rows_d += [ones(D), zeros(D)]                     # interm BN gamma / beta
    p["vecD"] = jnp.stack(rows_d, axis=0)

    rows_f = [bias(D, F) + bias(D, F)]                # interm fc_out[1]+fc_out[0] biases
    rows_f += [ones(F) for _ in range(NU)]            # out-stack BN gammas
    rows_f += [zeros(F) for _ in range(NU)]           # out-stack BN betas
    rows_f += [bias(F, F) for _ in range(NU)]         # out-stack fc_out biases
    rows_f += [bias(F, F)]                            # l_fc_out bias
    p["vecF"] = jnp.stack(rows_f, axis=0)

    assert p["vecD"].shape == (N_VEC_D, D)
    assert p["vecF"].shape == (N_VEC_F, F)
    return p


# ---- pure-JAX reference (identical math path, for a correctness check) ------
def reference_forward(x, p):
    return _forward(x, *[p[k] for k in PARAM_ORDER])


if __name__ == "__main__":
    root = jax.random.PRNGKey(0)
    kx, kp = jax.random.split(root)
    x = jax.random.normal(kx, (BATCH, INPUT_SIZE), jnp.float32)
    params = init_params(kp)

    y = jax.block_until_ready(get_resnet_forward(x, params))
    y_ref = reference_forward(x, params)

    assert y.shape == (BATCH, FC_SIZE)
    assert jnp.allclose(y, y_ref, rtol=1e-2, atol=1e-2), "kernel mismatch vs reference"

    print("KERNEL_OK")
</pallas_src>

<mosaic_0001>
module attributes {stable_mosaic.version = 11 : i64} {
  func.func @resnet_kernel(%arg0: memref<8x256xf32, #tpu.memory_space<vmem>>, %arg1: memref<256x256xbf16, #tpu.memory_space<vmem>>, %arg2: memref<2x256x256xbf16, #tpu.memory_space<vmem>>, %arg3: memref<2x256x256xbf16, #tpu.memory_space<vmem>>, %arg4: memref<256x256xbf16, #tpu.memory_space<vmem>>, %arg5: memref<512x128xbf16, #tpu.memory_space<vmem>>, %arg6: memref<2x128x128xbf16, #tpu.memory_space<vmem>>, %arg7: memref<2x128x128xbf16, #tpu.memory_space<vmem>>, %arg8: memref<128x128xbf16, #tpu.memory_space<vmem>>, %arg9: memref<10x256xf32, #tpu.memory_space<vmem>>, %arg10: memref<8x128xf32, #tpu.memory_space<vmem>>, %arg11: memref<8x128xf32, #tpu.memory_space<vmem>>) attributes {dimension_semantics = [], scalar_prefetch = 0 : i64, scratch_operands = 0 : i64, tpu.core_type = #tpu.core_type<tc>} {
    %c0 = arith.constant 0 : index
    %c0_0 = arith.constant 0 : index
    %0 = vector.load %arg0[%c0, %c0_0] : memref<8x256xf32, #tpu.memory_space<vmem>>, vector<8x256xf32>
    %c0_1 = arith.constant 0 : index
    %c0_2 = arith.constant 0 : index
    %1 = vector.load %arg1[%c0_1, %c0_2] : memref<256x256xbf16, #tpu.memory_space<vmem>>, vector<256x256xbf16>
    %2 = arith.truncf %0 : vector<8x256xf32> to vector<8x256xbf16>
    %cst = arith.constant dense<0.000000e+00> : vector<8x256xf32>
    %3 = tpu.matmul %2, %1, %cst {dimension_numbers = #tpu.dot_dimension_numbers<[1], [0], [0], [1], [0, 0, 1, 1], [], []>} : vector<8x256xbf16>, vector<256x256xbf16>, vector<8x256xf32> -> vector<8x256xf32>
    %c0_3 = arith.constant 0 : index
    %c0_4 = arith.constant 0 : index
    %4 = vector.load %arg9[%c0_3, %c0_4] : memref<10x256xf32, #tpu.memory_space<vmem>>, vector<1x256xf32>
    %c1 = arith.constant 1 : index
    %c0_5 = arith.constant 0 : index
    %5 = vector.load %arg9[%c1, %c0_5] : memref<10x256xf32, #tpu.memory_space<vmem>>, vector<1x256xf32>
    %cst_6 = arith.constant dense<0.000000e+00> : vector<256xf32>
    %6 = vector.multi_reduction <add>, %3, %cst_6 [0] : vector<8x256xf32> to vector<256xf32>
    %7 = vector.shape_cast %6 : vector<256xf32> to vector<1x256xf32>
    %cst_7 = arith.constant 8.000000e+00 : f32
    %8 = vector.broadcast %cst_7 : f32 to vector<1x256xf32>
    %9 = arith.divf %7, %8 : vector<1x256xf32>
    %10 = vector.broadcast %9 : vector<1x256xf32> to vector<8x256xf32>
    %11 = arith.subf %3, %10 : vector<8x256xf32>
    %12 = arith.mulf %11, %11 : vector<8x256xf32>
    %cst_8 = arith.constant dense<0.000000e+00> : vector<256xf32>
    %13 = vector.multi_reduction <add>, %12, %cst_8 [0] : vector<8x256xf32> to vector<256xf32>
    %14 = vector.shape_cast %13 : vector<256xf32> to vector<1x256xf32>
    %cst_9 = arith.constant 8.000000e+00 : f32
    %15 = vector.broadcast %cst_9 : f32 to vector<1x256xf32>
    %16 = arith.divf %14, %15 : vector<1x256xf32>
    %cst_10 = arith.constant 9.99999974E-6 : f32
    %17 = vector.broadcast %cst_10 : f32 to vector<1x256xf32>
    %18 = arith.addf %16, %17 : vector<1x256xf32>
    %19 = math.rsqrt %18 : vector<1x256xf32>
    %20 = arith.mulf %4, %19 : vector<1x256xf32>
    %21 = vector.broadcast %20 : vector<1x256xf32> to vector<8x256xf32>
    %22 = arith.mulf %11, %21 : vector<8x256xf32>
    %23 = vector.broadcast %5 : vector<1x256xf32> to vector<8x256xf32>
    %24 = arith.addf %22, %23 : vector<8x256xf32>
    %c0_11 = arith.constant 0 : index
    %c0_12 = arith.constant 0 : index
    %c0_13 = arith.constant 0 : index
    %25 = vector.load %arg2[%c0_11, %c0_12, %c0_13] : memref<2x256x256xbf16, #tpu.memory_space<vmem>>, vector<1x256x256xbf16>
    %26 = vector.shape_cast %25 : vector<1x256x256xbf16> to vector<256x256xbf16>
    %27 = arith.truncf %24 : vector<8x256xf32> to vector<8x256xbf16>
    %cst_14 = arith.constant dense<0.000000e+00> : vector<8x256xf32>
    %28 = tpu.matmul %27, %26, %cst_14 {dimension_numbers = #tpu.dot_dimension_numbers<[1], [0], [0], [1], [0, 0, 1, 1], [], []>} : vector<8x256xbf16>, vector<256x256xbf16>, vector<8x256xf32> -> vector<8x256xf32>
    %c2 = arith.constant 2 : index
    %c0_15 = arith.constant 0 : index
    %29 = vector.load %arg9[%c2, %c0_15] : memref<10x256xf32, #tpu.memory_space<vmem>>, vector<1x256xf32>
    %c4 = arith.constant 4 : index
    %c0_16 = arith.constant 0 : index
    %30 = vector.load %arg9[%c4, %c0_16] : memref<10x256xf32, #tpu.memory_space<vmem>>, vector<1x256xf32>
    %cst_17 = arith.constant dense<0.000000e+00> : vector<256xf32>
    %31 = vector.multi_reduction <add>, %28, %cst_17 [0] : vector<8x256xf32> to vector<256xf32>
    %32 = vector.shape_cast %31 : vector<256xf32> to vector<1x256xf32>
    %cst_18 = arith.constant 8.000000e+00 : f32
    %33 = vector.broadcast %cst_18 : f32 to vector<1x256xf32>
    %34 = arith.divf %32, %33 : vector<1x256xf32>
    %35 = vector.broadcast %34 : vector<1x256xf32> to vector<8x256xf32>
    %36 = arith.subf %28, %35 : vector<8x256xf32>
    %37 = arith.mulf %36, %36 : vector<8x256xf32>
    %cst_19 = arith.constant dense<0.000000e+00> : vector<256xf32>
    %38 = vector.multi_reduction <add>, %37, %cst_19 [0] : vector<8x256xf32> to vector<256xf32>
    %39 = vector.shape_cast %38 : vector<256xf32> to vector<1x256xf32>
    %cst_20 = arith.constant 8.000000e+00 : f32
    %40 = vector.broadcast %cst_20 : f32 to vector<1x256xf32>
    %41 = arith.divf %39, %40 : vector<1x256xf32>
    %cst_21 = arith.constant 9.99999974E-6 : f32
    %42 = vector.broadcast %cst_21 : f32 to vector<1x256xf32>
    %43 = arith.addf %41, %42 : vector<1x256xf32>
    %44 = math.rsqrt %43 : vector<1x256xf32>
    %45 = arith.mulf %29, %44 : vector<1x256xf32>
    %46 = vector.broadcast %45 : vector<1x256xf32> to vector<8x256xf32>
    %47 = arith.mulf %36, %46 : vector<8x256xf32>
    %48 = vector.broadcast %30 : vector<1x256xf32> to vector<8x256xf32>
    %49 = arith.addf %47, %48 : vector<8x256xf32>
    %cst_22 = arith.constant 0.000000e+00 : f32
    %50 = vector.broadcast %cst_22 : f32 to vector<8x256xf32>
    %51 = arith.maximumf %49, %50 : vector<8x256xf32>
    %c0_23 = arith.constant 0 : index
    %c0_24 = arith.constant 0 : index
    %c0_25 = arith.constant 0 : index
    %52 = vector.load %arg3[%c0_23, %c0_24, %c0_25] : memref<2x256x256xbf16, #tpu.memory_space<vmem>>, vector<1x256x256xbf16>
    %53 = vector.shape_cast %52 : vector<1x256x256xbf16> to vector<256x256xbf16>
    %54 = arith.truncf %51 : vector<8x256xf32> to vector<8x256xbf16>
    %cst_26 = arith.constant dense<0.000000e+00> : vector<8x256xf32>
    %55 = tpu.matmul %54, %53, %cst_26 {dimension_numbers = #tpu.dot_dimension_numbers<[1], [0], [0], [1], [0, 0, 1, 1], [], []>} : vector<8x256xbf16>, vector<256x256xbf16>, vector<8x256xf32> -> vector<8x256xf32>
    %56 = arith.addf %24, %55 : vector<8x256xf32>
    %c6 = arith.constant 6 : index
    %c0_27 = arith.constant 0 : index
    %57 = vector.load %arg9[%c6, %c0_27] : memref<10x256xf32, #tpu.memory_space<vmem>>, vector<1x256xf32>
    %58 = vector.broadcast %57 : vector<1x256xf32> to vector<8x256xf32>
    %59 = arith.addf %56, %58 : vector<8x256xf32>
    %cst_28 = arith.constant 0.000000e+00 : f32
    %60 = vector.broadcast %cst_28 : f32 to vector<8x256xf32>
    %61 = arith.maximumf %59, %60 : vector<8x256xf32>
    %c1_29 = arith.constant 1 : index
    %c0_30 = arith.constant 0 : index
    %c0_31 = arith.constant 0 : index
    %62 = vector.load %arg2[%c1_29, %c0_30, %c0_31] : memref<2x256x256xbf16, #tpu.memory_space<vmem>>, vector<1x256x256xbf16>
    %63 = vector.shape_cast %62 : vector<1x256x256xbf16> to vector<256x256xbf16>
    %64 = arith.truncf %61 : vector<8x256xf32> to vector<8x256xbf16>
    %cst_32 = arith.constant dense<0.000000e+00> : vector<8x256xf32>
    %65 = tpu.matmul %64, %63, %cst_32 {dimension_numbers = #tpu.dot_dimension_numbers<[1], [0], [0], [1], [0, 0, 1, 1], [], []>} : vector<8x256xbf16>, vector<256x256xbf16>, vector<8x256xf32> -> vector<8x256xf32>
    %c3 = arith.constant 3 : index
    %c0_33 = arith.constant 0 : index
    %66 = vector.load %arg9[%c3, %c0_33] : memref<10x256xf32, #tpu.memory_space<vmem>>, vector<1x256xf32>
    %c5 = arith.constant 5 : index
    %c0_34 = arith.constant 0 : index
    %67 = vector.load %arg9[%c5, %c0_34] : memref<10x256xf32, #tpu.memory_space<vmem>>, vector<1x256xf32>
    %cst_35 = arith.constant dense<0.000000e+00> : vector<256xf32>
    %68 = vector.multi_reduction <add>, %65, %cst_35 [0] : vector<8x256xf32> to vector<256xf32>
    %69 = vector.shape_cast %68 : vector<256xf32> to vector<1x256xf32>
    %cst_36 = arith.constant 8.000000e+00 : f32
    %70 = vector.broadcast %cst_36 : f32 to vector<1x256xf32>
    %71 = arith.divf %69, %70 : vector<1x256xf32>
    %72 = vector.broadcast %71 : vector<1x256xf32> to vector<8x256xf32>
    %73 = arith.subf %65, %72 : vector<8x256xf32>
    %74 = arith.mulf %73, %73 : vector<8x256xf32>
    %cst_37 = arith.constant dense<0.000000e+00> : vector<256xf32>
    %75 = vector.multi_reduction <add>, %74, %cst_37 [0] : vector<8x256xf32> to vector<256xf32>
    %76 = vector.shape_cast %75 : vector<256xf32> to vector<1x256xf32>
    %cst_38 = arith.constant 8.000000e+00 : f32
    %77 = vector.broadcast %cst_38 : f32 to vector<1x256xf32>
    %78 = arith.divf %76, %77 : vector<1x256xf32>
    %cst_39 = arith.constant 9.99999974E-6 : f32
    %79 = vector.broadcast %cst_39 : f32 to vector<1x256xf32>
    %80 = arith.addf %78, %79 : vector<1x256xf32>
    %81 = math.rsqrt %80 : vector<1x256xf32>
    %82 = arith.mulf %66, %81 : vector<1x256xf32>
    %83 = vector.broadcast %82 : vector<1x256xf32> to vector<8x256xf32>
    %84 = arith.mulf %73, %83 : vector<8x256xf32>
    %85 = vector.broadcast %67 : vector<1x256xf32> to vector<8x256xf32>
    %86 = arith.addf %84, %85 : vector<8x256xf32>
    %cst_40 = arith.constant 0.000000e+00 : f32
    %87 = vector.broadcast %cst_40 : f32 to vector<8x256xf32>
    %88 = arith.maximumf %86, %87 : vector<8x256xf32>
    %c1_41 = arith.constant 1 : index
    %c0_42 = arith.constant 0 : index
    %c0_43 = arith.constant 0 : index
    %89 = vector.load %arg3[%c1_41, %c0_42, %c0_43] : memref<2x256x256xbf16, #tpu.memory_space<vmem>>, vector<1x256x256xbf16>
    %90 = vector.shape_cast %89 : vector<1x256x256xbf16> to vector<256x256xbf16>
    %91 = arith.truncf %88 : vector<8x256xf32> to vector<8x256xbf16>
    %cst_44 = arith.constant dense<0.000000e+00> : vector<8x256xf32>
    %92 = tpu.matmul %91, %90, %cst_44 {dimension_numbers = #tpu.dot_dimension_numbers<[1], [0], [0], [1], [0, 0, 1, 1], [], []>} : vector<8x256xbf16>, vector<256x256xbf16>, vector<8x256xf32> -> vector<8x256xf32>
    %93 = arith.addf %61, %92 : vector<8x256xf32>
    %c7 = arith.constant 7 : index
    %c0_45 = arith.constant 0 : index
    %94 = vector.load %arg9[%c7, %c0_45] : memref<10x256xf32, #tpu.memory_space<vmem>>, vector<1x256xf32>
    %95 = vector.broadcast %94 : vector<1x256xf32> to vector<8x256xf32>
    %96 = arith.addf %93, %95 : vector<8x256xf32>
    %cst_46 = arith.constant 0.000000e+00 : f32
    %97 = vector.broadcast %cst_46 : f32 to vector<8x256xf32>
    %98 = arith.maximumf %96, %97 : vector<8x256xf32>
    %c0_47 = arith.constant 0 : index
    %c0_48 = arith.constant 0 : index
    %99 = vector.load %arg4[%c0_47, %c0_48] : memref<256x256xbf16, #tpu.memory_space<vmem>>, vector<256x256xbf16>
    %100 = arith.truncf %98 : vector<8x256xf32> to vector<8x256xbf16>
    %cst_49 = arith.constant dense<0.000000e+00> : vector<8x256xf32>
    %101 = tpu.matmul %100, %99, %cst_49 {dimension_numbers = #tpu.dot_dimension_numbers<[1], [0], [0], [1], [0, 0, 1, 1], [], []>} : vector<8x256xbf16>, vector<256x256xbf16>, vector<8x256xf32> -> vector<8x256xf32>
    %c8 = arith.constant 8 : index
    %c0_50 = arith.constant 0 : index
    %102 = vector.load %arg9[%c8, %c0_50] : memref<10x256xf32, #tpu.memory_space<vmem>>, vector<1x256xf32>
    %c9 = arith.constant 9 : index
    %c0_51 = arith.constant 0 : index
    %103 = vector.load %arg9[%c9, %c0_51] : memref<10x256xf32, #tpu.memory_space<vmem>>, vector<1x256xf32>
    %cst_52 = arith.constant dense<0.000000e+00> : vector<256xf32>
    %104 = vector.multi_reduction <add>, %101, %cst_52 [0] : vector<8x256xf32> to vector<256xf32>
    %105 = vector.shape_cast %104 : vector<256xf32> to vector<1x256xf32>
    %cst_53 = arith.constant 8.000000e+00 : f32
    %106 = vector.broadcast %cst_53 : f32 to vector<1x256xf32>
    %107 = arith.divf %105, %106 : vector<1x256xf32>
    %108 = vector.broadcast %107 : vector<1x256xf32> to vector<8x256xf32>
    %109 = arith.subf %101, %108 : vector<8x256xf32>
    %110 = arith.mulf %109, %109 : vector<8x256xf32>
    %cst_54 = arith.constant dense<0.000000e+00> : vector<256xf32>
    %111 = vector.multi_reduction <add>, %110, %cst_54 [0] : vector<8x256xf32> to vector<256xf32>
    %112 = vector.shape_cast %111 : vector<256xf32> to vector<1x256xf32>
    %cst_55 = arith.constant 8.000000e+00 : f32
    %113 = vector.broadcast %cst_55 : f32 to vector<1x256xf32>
    %114 = arith.divf %112, %113 : vector<1x256xf32>
    %cst_56 = arith.constant 9.99999974E-6 : f32
    %115 = vector.broadcast %cst_56 : f32 to vector<1x256xf32>
    %116 = arith.addf %114, %115 : vector<1x256xf32>
    %117 = math.rsqrt %116 : vector<1x256xf32>
    %118 = arith.mulf %102, %117 : vector<1x256xf32>
    %119 = vector.broadcast %118 : vector<1x256xf32> to vector<8x256xf32>
    %120 = arith.mulf %109, %119 : vector<8x256xf32>
    %121 = vector.broadcast %103 : vector<1x256xf32> to vector<8x256xf32>
    %122 = arith.addf %120, %121 : vector<8x256xf32>
    %cst_57 = arith.constant 0.000000e+00 : f32
    %123 = vector.broadcast %cst_57 : f32 to vector<8x256xf32>
    %124 = arith.maximumf %122, %123 : vector<8x256xf32>
    %125 = tpu.concatenate %98, %124 in 1 : vector<8x256xf32>, vector<8x256xf32> -> vector<8x512xf32>
    %c0_58 = arith.constant 0 : index
    %c0_59 = arith.constant 0 : index
    %126 = vector.load %arg5[%c0_58, %c0_59] : memref<512x128xbf16, #tpu.memory_space<vmem>>, vector<512x128xbf16>
    %127 = arith.truncf %125 : vector<8x512xf32> to vector<8x512xbf16>
    %cst_60 = arith.constant dense<0.000000e+00> : vector<8x128xf32>
    %128 = tpu.matmul %127, %126, %cst_60 {dimension_numbers = #tpu.dot_dimension_numbers<[1], [0], [0], [1], [0, 0, 1, 1], [], []>} : vector<8x512xbf16>, vector<512x128xbf16>, vector<8x128xf32> -> vector<8x128xf32>
    %c0_61 = arith.constant 0 : index
    %c0_62 = arith.constant 0 : index
    %129 = vector.load %arg10[%c0_61, %c0_62] : memref<8x128xf32, #tpu.memory_space<vmem>>, vector<1x128xf32>
    %130 = vector.broadcast %129 : vector<1x128xf32> to vector<8x128xf32>
    %131 = arith.addf %128, %130 : vector<8x128xf32>
    %cst_63 = arith.constant 0.000000e+00 : f32
    %132 = vector.broadcast %cst_63 : f32 to vector<8x128xf32>
    %133 = arith.maximumf %131, %132 : vector<8x128xf32>
    %c0_64 = arith.constant 0 : index
    %c0_65 = arith.constant 0 : index
    %c0_66 = arith.constant 0 : index
    %134 = vector.load %arg6[%c0_64, %c0_65, %c0_66] : memref<2x128x128xbf16, #tpu.memory_space<vmem>>, vector<1x128x128xbf16>
    %135 = vector.shape_cast %134 : vector<1x128x128xbf16> to vector<128x128xbf16>
    %136 = arith.truncf %133 : vector<8x128xf32> to vector<8x128xbf16>
    %cst_67 = arith.constant dense<0.000000e+00> : vector<8x128xf32>
    %137 = tpu.matmul %136, %135, %cst_67 {dimension_numbers = #tpu.dot_dimension_numbers<[1], [0], [0], [1], [0, 0, 1, 1], [], []>} : vector<8x128xbf16>, vector<128x128xbf16>, vector<8x128xf32> -> vector<8x128xf32>
    %c1_68 = arith.constant 1 : index
    %c0_69 = arith.constant 0 : index
    %138 = vector.load %arg10[%c1_68, %c0_69] : memref<8x128xf32, #tpu.memory_space<vmem>>, vector<1x128xf32>
    %c3_70 = arith.constant 3 : index
    %c0_71 = arith.constant 0 : index
    %139 = vector.load %arg10[%c3_70, %c0_71] : memref<8x128xf32, #tpu.memory_space<vmem>>, vector<1x128xf32>
    %cst_72 = arith.constant dense<0.000000e+00> : vector<128xf32>
    %140 = vector.multi_reduction <add>, %137, %cst_72 [0] : vector<8x128xf32> to vector<128xf32>
    %141 = vector.shape_cast %140 : vector<128xf32> to vector<1x128xf32>
    %cst_73 = arith.constant 8.000000e+00 : f32
    %142 = vector.broadcast %cst_73 : f32 to vector<1x128xf32>
    %143 = arith.divf %141, %142 : vector<1x128xf32>
    %144 = vector.broadcast %143 : vector<1x128xf32> to vector<8x128xf32>
    %145 = arith.subf %137, %144 : vector<8x128xf32>
    %146 = arith.mulf %145, %145 : vector<8x128xf32>
    %cst_74 = arith.constant dense<0.000000e+00> : vector<128xf32>
    %147 = vector.multi_reduction <add>, %146, %cst_74 [0] : vector<8x128xf32> to vector<128xf32>
    %148 = vector.shape_cast %147 : vector<128xf32> to vector<1x128xf32>
    %cst_75 = arith.constant 8.000000e+00 : f32
    %149 = vector.broadcast %cst_75 : f32 to vector<1x128xf32>
    %150 = arith.divf %148, %149 : vector<1x128xf32>
    %cst_76 = arith.constant 9.99999974E-6 : f32
    %151 = vector.broadcast %cst_76 : f32 to vector<1x128xf32>
    %152 = arith.addf %150, %151 : vector<1x128xf32>
    %153 = math.rsqrt %152 : vector<1x128xf32>
    %154 = arith.mulf %138, %153 : vector<1x128xf32>
    %155 = vector.broadcast %154 : vector<1x128xf32> to vector<8x128xf32>
    %156 = arith.mulf %145, %155 : vector<8x128xf32>
    %157 = vector.broadcast %139 : vector<1x128xf32> to vector<8x128xf32>
    %158 = arith.addf %156, %157 : vector<8x128xf32>
    %cst_77 = arith.constant 0.000000e+00 : f32
    %159 = vector.broadcast %cst_77 : f32 to vector<8x128xf32>
    %160 = arith.maximumf %158, %159 : vector<8x128xf32>
    %c0_78 = arith.constant 0 : index
    %c0_79 = arith.constant 0 : index
    %c0_80 = arith.constant 0 : index
    %161 = vector.load %arg7[%c0_78, %c0_79, %c0_80] : memref<2x128x128xbf16, #tpu.memory_space<vmem>>, vector<1x128x128xbf16>
    %162 = vector.shape_cast %161 : vector<1x128x128xbf16> to vector<128x128xbf16>
    %163 = arith.truncf %160 : vector<8x128xf32> to vector<8x128xbf16>
    %cst_81 = arith.constant dense<0.000000e+00> : vector<8x128xf32>
    %164 = tpu.matmul %163, %162, %cst_81 {dimension_numbers = #tpu.dot_dimension_numbers<[1], [0], [0], [1], [0, 0, 1, 1], [], []>} : vector<8x128xbf16>, vector<128x128xbf16>, vector<8x128xf32> -> vector<8x128xf32>
    %165 = arith.addf %133, %164 : vector<8x128xf32>
    %c5_82 = arith.constant 5 : index
    %c0_83 = arith.constant 0 : index
    %166 = vector.load %arg10[%c5_82, %c0_83] : memref<8x128xf32, #tpu.memory_space<vmem>>, vector<1x128xf32>
    %167 = vector.broadcast %166 : vector<1x128xf32> to vector<8x128xf32>
    %168 = arith.addf %165, %167 : vector<8x128xf32>
    %cst_84 = arith.constant 0.000000e+00 : f32
    %169 = vector.broadcast %cst_84 : f32 to vector<8x128xf32>
    %170 = arith.maximumf %168, %169 : vector<8x128xf32>
    %c1_85 = arith.constant 1 : index
    %c0_86 = arith.constant 0 : index
    %c0_87 = arith.constant 0 : index
    %171 = vector.load %arg6[%c1_85, %c0_86, %c0_87] : memref<2x128x128xbf16, #tpu.memory_space<vmem>>, vector<1x128x128xbf16>
    %172 = vector.shape_cast %171 : vector<1x128x128xbf16> to vector<128x128xbf16>
    %173 = arith.truncf %170 : vector<8x128xf32> to vector<8x128xbf16>
    %cst_88 = arith.constant dense<0.000000e+00> : vector<8x128xf32>
    %174 = tpu.matmul %173, %172, %cst_88 {dimension_numbers = #tpu.dot_dimension_numbers<[1], [0], [0], [1], [0, 0, 1, 1], [], []>} : vector<8x128xbf16>, vector<128x128xbf16>, vector<8x128xf32> -> vector<8x128xf32>
    %c2_89 = arith.constant 2 : index
    %c0_90 = arith.constant 0 : index
    %175 = vector.load %arg10[%c2_89, %c0_90] : memref<8x128xf32, #tpu.memory_space<vmem>>, vector<1x128xf32>
    %c4_91 = arith.constant 4 : index
    %c0_92 = arith.constant 0 : index
    %176 = vector.load %arg10[%c4_91, %c0_92] : memref<8x128xf32, #tpu.memory_space<vmem>>, vector<1x128xf32>
    %cst_93 = arith.constant dense<0.000000e+00> : vector<128xf32>
    %177 = vector.multi_reduction <add>, %174, %cst_93 [0] : vector<8x128xf32> to vector<128xf32>
    %178 = vector.shape_cast %177 : vector<128xf32> to vector<1x128xf32>
    %cst_94 = arith.constant 8.000000e+00 : f32
    %179 = vector.broadcast %cst_94 : f32 to vector<1x128xf32>
    %180 = arith.divf %178, %179 : vector<1x128xf32>
    %181 = vector.broadcast %180 : vector<1x128xf32> to vector<8x128xf32>
    %182 = arith.subf %174, %181 : vector<8x128xf32>
    %183 = arith.mulf %182, %182 : vector<8x128xf32>
    %cst_95 = arith.constant dense<0.000000e+00> : vector<128xf32>
    %184 = vector.multi_reduction <add>, %183, %cst_95 [0] : vector<8x128xf32> to vector<128xf32>
    %185 = vector.shape_cast %184 : vector<128xf32> to vector<1x128xf32>
    %cst_96 = arith.constant 8.000000e+00 : f32
    %186 = vector.broadcast %cst_96 : f32 to vector<1x128xf32>
    %187 = arith.divf %185, %186 : vector<1x128xf32>
    %cst_97 = arith.constant 9.99999974E-6 : f32
    %188 = vector.broadcast %cst_97 : f32 to vector<1x128xf32>
    %189 = arith.addf %187, %188 : vector<1x128xf32>
    %190 = math.rsqrt %189 : vector<1x128xf32>
    %191 = arith.mulf %175, %190 : vector<1x128xf32>
    %192 = vector.broadcast %191 : vector<1x128xf32> to vector<8x128xf32>
    %193 = arith.mulf %182, %192 : vector<8x128xf32>
    %194 = vector.broadcast %176 : vector<1x128xf32> to vector<8x128xf32>
    %195 = arith.addf %193, %194 : vector<8x128xf32>
    %cst_98 = arith.constant 0.000000e+00 : f32
    %196 = vector.broadcast %cst_98 : f32 to vector<8x128xf32>
    %197 = arith.maximumf %195, %196 : vector<8x128xf32>
    %c1_99 = arith.constant 1 : index
    %c0_100 = arith.constant 0 : index
    %c0_101 = arith.constant 0 : index
    %198 = vector.load %arg7[%c1_99, %c0_100, %c0_101] : memref<2x128x128xbf16, #tpu.memory_space<vmem>>, vector<1x128x128xbf16>
    %199 = vector.shape_cast %198 : vector<1x128x128xbf16> to vector<128x128xbf16>
    %200 = arith.truncf %197 : vector<8x128xf32> to vector<8x128xbf16>
    %cst_102 = arith.constant dense<0.000000e+00> : vector<8x128xf32>
    %201 = tpu.matmul %200, %199, %cst_102 {dimension_numbers = #tpu.dot_dimension_numbers<[1], [0], [0], [1], [0, 0, 1, 1], [], []>} : vector<8x128xbf16>, vector<128x128xbf16>, vector<8x128xf32> -> vector<8x128xf32>
    %202 = arith.addf %170, %201 : vector<8x128xf32>
    %c6_103 = arith.constant 6 : index
    %c0_104 = arith.constant 0 : index
    %203 = vector.load %arg10[%c6_103, %c0_104] : memref<8x128xf32, #tpu.memory_space<vmem>>, vector<1x128xf32>
    %204 = vector.broadcast %203 : vector<1x128xf32> to vector<8x128xf32>
    %205 = arith.addf %202, %204 : vector<8x128xf32>
    %cst_105 = arith.constant 0.000000e+00 : f32
    %206 = vector.broadcast %cst_105 : f32 to vector<8x128xf32>
    %207 = arith.maximumf %205, %206 : vector<8x128xf32>
    %c0_106 = arith.constant 0 : index
    %c0_107 = arith.constant 0 : index
    %208 = vector.load %arg8[%c0_106, %c0_107] : memref<128x128xbf16, #tpu.memory_space<vmem>>, vector<128x128xbf16>
    %209 = arith.truncf %207 : vector<8x128xf32> to vector<8x128xbf16>
    %cst_108 = arith.constant dense<0.000000e+00> : vector<8x128xf32>
    %210 = tpu.matmul %209, %208, %cst_108 {dimension_numbers = #tpu.dot_dimension_numbers<[1], [0], [0], [1], [0, 0, 1, 1], [], []>} : vector<8x128xbf16>, vector<128x128xbf16>, vector<8x128xf32> -> vector<8x128xf32>
    %c7_109 = arith.constant 7 : index
    %c0_110 = arith.constant 0 : index
    %211 = vector.load %arg10[%c7_109, %c0_110] : memref<8x128xf32, #tpu.memory_space<vmem>>, vector<1x128xf32>
    %212 = vector.broadcast %211 : vector<1x128xf32> to vector<8x128xf32>
    %213 = arith.addf %210, %212 : vector<8x128xf32>
    %c0_111 = arith.constant 0 : index
    %c0_112 = arith.constant 0 : index
    %214 = vector.load %arg11[%c0_111, %c0_112] : memref<8x128xf32, #tpu.memory_space<vmem>>, vector<8x128xf32>
    tpu.vector_store %arg11[%c0_111, %c0_112], %213 {strides = array<i32>} : memref<8x128xf32, #tpu.memory_space<vmem>>, vector<8x128xf32>,
    return
  }
}

</mosaic_0001>

<bundles_post_ra>
// kernel: tpu_custom_call.1
= control target key start
LH: loop header
LB: loop body
LE: loop exit
PB: predicated region body
PF: predicated region fallthrough
CT: control target
= control target key end

     0   :  { %16 = vsyncpa [#allocation3], 0  ;;  %s4813_s0 = inlined_call_operand.hbm [shape: f32[8,256], index: 0, kind: input, shape index: {}]   ;;  %s4814_s1 = inlined_call_operand.hbm [shape: bf16[256,256], index: 1, kind: input, shape index: {}]   ;;  %s4815_s2 = inlined_call_operand.hbm [shape: bf16[2,256,256], index: 2, kind: input, shape index: {}]   ;;  %s4816_s3 = inlined_call_operand.hbm [shape: bf16[2,256,256], index: 3, kind: input, shape index: {}]   ;;  %s4817_s4 = inlined_call_operand.hbm [shape: bf16[256,256], index: 4, kind: input, shape index: {}]   ;;  %s4818_s5 = inlined_call_operand.hbm [shape: bf16[512,128], index: 5, kind: input, shape index: {}]   ;;  %s4819_s6 = inlined_call_operand.hbm [shape: bf16[2,128,128], index: 6, kind: input, shape index: {}]   ;;  %s4820_s7 = inlined_call_operand.hbm [shape: bf16[2,128,128], index: 7, kind: input, shape index: {}]   ;;  %s4821_s8 = inlined_call_operand.hbm [shape: bf16[128,128], index: 8, kind: input, shape index: {}]   ;;  %s4822_s9 = inlined_call_operand.hbm [shape: f32[10,256], index: 9, kind: input, shape index: {}]   ;;  %s4823_s10 = inlined_call_operand.vmem [shape: f32[8,128], index: 10, kind: input, shape index: {}]   ;;  %s4824_s11 = inlined_call_operand.hbm [shape: f32[8,128], index: 11, kind: output, shape index: {}]  }
   0x1   :  { %17 = vsyncpa [#allocation6], 0 }
   0x2   :  { %18 = vsyncpa [#allocation9], 0 }
   0x3   :  { %19 = vsyncpa [#allocation12], 0 }
   0x4   :  { %20 = vsyncpa [#allocation15], 0 }
   0x5   :  { %21 = vsyncpa [#allocation18], 0  ;;  %s38_s19 = sshll.u32 %s4814_s1, 4  ;;  %s39_s19 = int_to_ptr.hbm [resolvable:$true] %s38_s19 }
   0x6   :  { %22 = vsyncpa [#allocation4], 0  ;;  %s4478_s20 = smov [#allocation5]   ;;  %s64_s24 = sshll.u32 %s4816_s3, 4  ;;  %s65_s24 = int_to_ptr.hbm [resolvable:$true] %s64_s24 }
   0x7   :  { %s40_s21 = sshll.u32 %s4478_s20, 4  ;;  %s4479_s25 = smov 128   ;;  %s41_s21 = int_to_ptr.vmem [resolvable:$true] %s40_s21 }
   0x8   :  { %s4480_s26 = smov 8   ;;  %s4481_s27 = smov [#allocation8]  }
   0x9   :  { %46 = dma.hbm_to_vmem [thread:$0]  %s39_s19, 4096, %s41_s21, [#allocation6], %s4479_s25, %s4479_s25, %s4480_s26  }
   0xa   :  { %s66_s28 = sshll.u32 %s4481_s27, 4  ;;  %s90_s30 = sshll.u32 %s4818_s5, 4  ;;  %s67_s28 = int_to_ptr.vmem [resolvable:$true] %s66_s28  ;;  %s91_s30 = int_to_ptr.hbm [resolvable:$true] %s90_s30 }
   0xb   :  { %72 = dma.hbm_to_vmem [thread:$0]  %s65_s24, 8192, %s67_s28, [#allocation9], %s4479_s25, %s4479_s25, %s4480_s26  }
   0xc   :  { %s4482_s3 = smov [#allocation11]   ;;  %s116_s15 = sshll.u32 %s4820_s7, 4  ;;  %s117_s15 = int_to_ptr.hbm [resolvable:$true] %s116_s15 }
   0xd   :  { %s92_s12 = sshll.u32 %s4482_s3, 4  ;;  %s4483_s16 = smov 64   ;;  %s93_s12 = int_to_ptr.vmem [resolvable:$true] %s92_s12 }
   0xe   :  { %s4484_s17 = smov 4   ;;  %s4485_s5 = smov [#allocation14]  }
   0xf   :  { %98 = dma.hbm_to_vmem [thread:$0]  %s91_s30, 4096, %s93_s12, [#allocation12], %s4483_s16, %s4483_s16, %s4484_s17  }
  0x10   :  { %s118_s18 = sshll.u32 %s4485_s5, 4  ;;  %s28_s21 = sshll.u32 %s4813_s0, 4  ;;  %s119_s18 = int_to_ptr.vmem [resolvable:$true] %s118_s18  ;;  %s29_s21 = int_to_ptr.hbm [resolvable:$true] %s28_s21 }
  0x11   :  { %124 = dma.hbm_to_vmem [thread:$0]  %s117_s15, 2048, %s119_s18, [#allocation15], %s4483_s16, %s4483_s16, %s4484_s17  }
  0x12   :  { %s51_s23 = sshll.u32 %s4815_s2, 4  ;;  %s4486_s24 = smov [#allocation2]   ;;  %s52_s23 = int_to_ptr.hbm [resolvable:$true] %s51_s23 }
  0x13   :  { %s30_s27 = sshll.u32 %s4486_s24, 4  ;;  %s4487_s28 = smov [#allocation7]   ;;  %s31_s27 = int_to_ptr.vmem [resolvable:$true] %s30_s27 }
  0x14   :  { %33 = dma.hbm_to_vmem [thread:$0]  %s29_s21, 256, %s31_s27, [#allocation3]  }
  0x15   :  { %s53_s29 = sshll.u32 %s4487_s28, 4  ;;  %s77_s0 = sshll.u32 %s4817_s4, 4  ;;  %s54_s29 = int_to_ptr.vmem [resolvable:$true] %s53_s29  ;;  %s78_s0 = int_to_ptr.hbm [resolvable:$true] %s77_s0 }
  0x16   :  { %59 = dma.hbm_to_vmem [thread:$0]  %s52_s23, 8192, %s54_s29, [#allocation6], %s4479_s25, %s4479_s25, %s4480_s26  }
  0x17   :  { %s103_s2 = sshll.u32 %s4819_s6, 4  ;;  %s4488_s13 = smov [#allocation10]   ;;  %s104_s2 = int_to_ptr.hbm [resolvable:$true] %s103_s2 }
  0x18   :  { %s79_s14 = sshll.u32 %s4488_s13, 4  ;;  %s4489_s15 = smov [#allocation13]   ;;  %s80_s14 = int_to_ptr.vmem [resolvable:$true] %s79_s14 }
  0x19   :  { %85 = dma.hbm_to_vmem [thread:$0]  %s78_s0, 4096, %s80_s14, [#allocation9], %s4479_s25, %s4479_s25, %s4480_s26  }
  0x1a   :  { %s105_s4 = sshll.u32 %s4489_s15, 4  ;;  %s129_s19 = sshll.u32 %s4821_s8, 4  ;;  %s106_s4 = int_to_ptr.vmem [resolvable:$true] %s105_s4  ;;  %s130_s19 = int_to_ptr.hbm [resolvable:$true] %s129_s19 }
  0x1b   :  { %111 = dma.hbm_to_vmem [thread:$0]  %s104_s2, 2048, %s106_s4, [#allocation12], %s4483_s16, %s4483_s16, %s4484_s17  }
  0x1c   :  { %s142_s21 = sshll.u32 %s4822_s9, 4  ;;  %s4490_s7 = smov [#allocation16]   ;;  %s143_s21 = int_to_ptr.hbm [resolvable:$true] %s142_s21 }
  0x1d   :  { %s131_s22 = sshll.u32 %s4490_s7, 4  ;;  %s4491_s25 = smov [#allocation17]   ;;  %s132_s22 = int_to_ptr.vmem [resolvable:$true] %s131_s22 }
  0x1e   :  { %137 = dma.hbm_to_vmem [thread:$0]  %s130_s19, 1024, %s132_s22, [#allocation15], %s4483_s16, %s4483_s16, %s4484_s17  }
  0x1f   :  { %s144_s8 = sshll.u32 %s4491_s25, 4  ;;  %s4492_s26 = smov 256   ;;  %s145_s8 = int_to_ptr.vmem [resolvable:$true] %s144_s8 }
  0x20   :  { %s4493_s23 = smov 16  }
  0x21   :  { %150 = dma.hbm_to_vmem [thread:$0]  %s143_s21, 512, %s145_s8, [#allocation18], %s4492_s26, %s4492_s26, %s4493_s23  }
  0x22   :  { %4464 = dma.done.wait [#allocation3], 256  }
  0x23   :  { %4465 = vsyncadd [#allocation3], 4294967040 }
  0x24   :  { %4466 = dma.done.wait [#allocation6], 12288  }
  0x25   :  { %4467 = vsyncadd [#allocation6], 4294955008 }
  0x26   :  { %4468 = dma.done.wait [#allocation9], 12288  }
  0x27   :  { %4469 = vsyncadd [#allocation9], 4294955008 }
  0x28   :  { %4470 = dma.done.wait [#allocation12], 6144  }
  0x29   :  { %4471 = vsyncadd [#allocation12], 4294961152 }
  0x2a   :  { %4472 = dma.done.wait [#allocation15], 3072  }
  0x2b   :  { %4473 = vsyncadd [#allocation15], 4294964224 }
  0x2c   :  { %4474 = dma.done.wait [#allocation18], 512  }
  0x2d   :  { %4475 = vsyncadd [#allocation18], 4294966784  ;;  %v2892_v0 = vld [vmem:[#allocation5 + $0x70] sm:$0xf]  ;;  %v3905_v1 = vld [vmem:[#allocation5 + $0x74] sm:$0xf0] }
  0x2e   :  { %v2956_v2 = vld [vmem:[#allocation5 + $0xf0] sm:$0xf]  ;;  %v2893_v3 = vor.u32 %v3905_v1, %v2892_v0  ;;  %v3921_v4 = vld [vmem:[#allocation5 + $0xf4] sm:$0xf0]  ;;  %v3904_v5 = vld [vmem:[#allocation5 + $0x74] sm:$0xf] }
  0x2f   :  { %v2894_v6 = vld [vmem:[#allocation5 + $0x78] sm:$0xf0]  ;;  %v2957_v7 = vor.u32 %v3921_v4, %v2956_v2  ;;  %v3920_v9 = vld [vmem:[#allocation5 + $0xf4] sm:$0xf]  ;;  %v2884_v11 = vld [vmem:[#allocation5 + $0x60] sm:$0xf] }
  0x30   :  { %v2897_v8 = vor.u32 %v3904_v5, %v2894_v6  ;;  %v2958_v10 = vld [vmem:[#allocation5 + $0xf8] sm:$0xf0]  ;;  %389 = vmatpush.bf16.msra.mxu0 %v2893_v3  ;;  %v3903_v13 = vld [vmem:[#allocation5 + $0x64] sm:$0xf0]  ;;  %v2948_v14 = vld [vmem:[#allocation5 + $0xe0] sm:$0xf] }
  0x31   :  { %v2961_v12 = vor.u32 %v3920_v9, %v2958_v10  ;;  %v3919_v15 = vld [vmem:[#allocation5 + $0xe4] sm:$0xf0]  ;;  %402 = vmatpush.bf16.msra.mxu1 %v2957_v7  ;;  %v2885_v16 = vor.u32 %v3903_v13, %v2884_v11  ;;  %v3902_v18 = vld [vmem:[#allocation5 + $0x64] sm:$0xf]  ;;  %v2886_v19 = vld [vmem:[#allocation5 + $0x68] sm:$0xf0] }
  0x32   :  { %415 = vmatpush.bf16.msra.mxu2 %v2897_v8  ;;  %v2949_v17 = vor.u32 %v3919_v15, %v2948_v14  ;;  %v3918_v20 = vld [vmem:[#allocation5 + $0xe4] sm:$0xf]  ;;  %v2889_v21 = vor.u32 %v3902_v18, %v2886_v19  ;;  %v2950_v22 = vld [vmem:[#allocation5 + $0xe8] sm:$0xf0]  ;;  %v2876_v23 = vld [vmem:[#allocation5 + $0x50] sm:$0xf] }
  0x33   :  { %428 = vmatpush.bf16.msra.mxu3 %v2961_v12  ;;  %v3901_v24 = vld [vmem:[#allocation5 + $0x54] sm:$0xf0]  ;;  %v2953_v25 = vor.u32 %v3918_v20, %v2950_v22  ;;  %v2940_v26 = vld [vmem:[#allocation5 + $0xd0] sm:$0xf]  ;;  %v3900_v28 = vld [vmem:[#allocation5 + $0x54] sm:$0xf] }
  0x34   :  { %v3917_v27 = vld [vmem:[#allocation5 + $0xd4] sm:$0xf0]  ;;  %390 = vmatpush.bf16.msra.mxu0 %v2885_v16  ;;  %v2877_v29 = vor.u32 %v3901_v24, %v2876_v23  ;;  %v2878_v30 = vld [vmem:[#allocation5 + $0x58] sm:$0xf0]  ;;  %v3916_v31 = vld [vmem:[#allocation5 + $0xd4] sm:$0xf] }
  0x35   :  { %v2942_v32 = vld [vmem:[#allocation5 + $0xd8] sm:$0xf0]  ;;  %403 = vmatpush.bf16.msra.mxu1 %v2949_v17  ;;  %v2941_v33 = vor.u32 %v3917_v27, %v2940_v26  ;;  %v2881_v34 = vor.u32 %v3900_v28, %v2878_v30  ;;  %v2868_v35 = vld [vmem:[#allocation5 + $0x40] sm:$0xf]  ;;  %v3899_v36 = vld [vmem:[#allocation5 + $0x44] sm:$0xf0] }
  0x36   :  { %416 = vmatpush.bf16.msra.mxu2 %v2889_v21  ;;  %v2932_v37 = vld [vmem:[#allocation5 + $0xc0] sm:$0xf]  ;;  %v2945_v38 = vor.u32 %v3916_v31, %v2942_v32  ;;  %v3915_v39 = vld [vmem:[#allocation5 + $0xc4] sm:$0xf0]  ;;  %v3898_v40 = vld [vmem:[#allocation5 + $0x44] sm:$0xf]  ;;  %v2869_v44 = vor.u32 %v3899_v36, %v2868_v35 }
  0x37   :  { %429 = vmatpush.bf16.msra.mxu3 %v2953_v25  ;;  %v2870_v41 = vld [vmem:[#allocation5 + $0x48] sm:$0xf0]  ;;  %v3914_v42 = vld [vmem:[#allocation5 + $0xc4] sm:$0xf]  ;;  %v2933_v45 = vor.u32 %v3915_v39, %v2932_v37  ;;  %v2860_v47 = vld [vmem:[#allocation5 + $0x30] sm:$0xf] }
  0x38   :  { %v2934_v43 = vld [vmem:[#allocation5 + $0xc8] sm:$0xf0]  ;;  %391 = vmatpush.bf16.msra.mxu0 %v2877_v29  ;;  %v2873_v46 = vor.u32 %v3898_v40, %v2870_v41  ;;  %v3897_v48 = vld [vmem:[#allocation5 + $0x34] sm:$0xf0]  ;;  %v2924_v49 = vld [vmem:[#allocation5 + $0xb0] sm:$0xf] }
  0x39   :  { %404 = vmatpush.bf16.msra.mxu1 %v2941_v33  ;;  %v2937_v50 = vor.u32 %v3914_v42, %v2934_v43  ;;  %v3913_v51 = vld [vmem:[#allocation5 + $0xb4] sm:$0xf0]  ;;  %v3896_v52 = vld [vmem:[#allocation5 + $0x34] sm:$0xf]  ;;  %v2862_v53 = vld [vmem:[#allocation5 + $0x38] sm:$0xf0]  ;;  %v2861_v56 = vor.u32 %v3897_v48, %v2860_v47 }
  0x3a   :  { %417 = vmatpush.bf16.msra.mxu2 %v2881_v34  ;;  %v3912_v54 = vld [vmem:[#allocation5 + $0xb4] sm:$0xf]  ;;  %v2926_v55 = vld [vmem:[#allocation5 + $0xb8] sm:$0xf0]  ;;  %v2925_v57 = vor.u32 %v3913_v51, %v2924_v49  ;;  %v2865_v58 = vor.u32 %v3896_v52, %v2862_v53  ;;  %v2852_v59 = vld [vmem:[#allocation5 + $0x20] sm:$0xf] }
  0x3b   :  { %430 = vmatpush.bf16.msra.mxu3 %v2945_v38  ;;  %v3895_v60 = vld [vmem:[#allocation5 + $0x24] sm:$0xf0]  ;;  %v2916_v61 = vld [vmem:[#allocation5 + $0xa0] sm:$0xf]  ;;  %v2929_v62 = vor.u32 %v3912_v54, %v2926_v55  ;;  %v3894_v0 = vld [vmem:[#allocation5 + $0x24] sm:$0xf] }
  0x3c   :  { %392 = vmatpush.bf16.msra.mxu0 %v2869_v44  ;;  %v3911_v63 = vld [vmem:[#allocation5 + $0xa4] sm:$0xf0]  ;;  %v2854_v1 = vld [vmem:[#allocation5 + $0x28] sm:$0xf0]  ;;  %v3910_v2 = vld [vmem:[#allocation5 + $0xa4] sm:$0xf]  ;;  %v2853_v4 = vor.u32 %v3895_v60, %v2852_v59 }
  0x3d   :  { %405 = vmatpush.bf16.msra.mxu1 %v2933_v45  ;;  %v2918_v3 = vld [vmem:[#allocation5 + $0xa8] sm:$0xf0]  ;;  %v2844_v5 = vld [vmem:[#allocation5 + $0x10] sm:$0xf]  ;;  %v3893_v6 = vld [vmem:[#allocation5 + $0x14] sm:$0xf0]  ;;  %v2917_v7 = vor.u32 %v3911_v63, %v2916_v61  ;;  %v2857_v8 = vor.u32 %v3894_v0, %v2854_v1 }
  0x3e   :  { %418 = vmatpush.bf16.msra.mxu2 %v2873_v46  ;;  %v2908_v9 = vld [vmem:[#allocation5 + $0x90] sm:$0xf]  ;;  %v3909_v10 = vld [vmem:[#allocation5 + $0x94] sm:$0xf0]  ;;  %v3892_v11 = vld [vmem:[#allocation5 + $0x14] sm:$0xf]  ;;  %v2921_v12 = vor.u32 %v3910_v2, %v2918_v3  ;;  %v2845_v16 = vor.u32 %v3893_v6, %v2844_v5 }
  0x3f   :  { %431 = vmatpush.bf16.msra.mxu3 %v2937_v50  ;;  %v2846_v13 = vld [vmem:[#allocation5 + $0x18] sm:$0xf0]  ;;  %v3908_v14 = vld [vmem:[#allocation5 + $0x94] sm:$0xf]  ;;  %v2909_v17 = vor.u32 %v3909_v10, %v2908_v9  ;;  %v2836_v19 = vld [vmem:[#allocation5] sm:$0xf] }
  0x40   :  { %393 = vmatpush.bf16.msra.mxu0 %v2861_v56  ;;  %v2910_v15 = vld [vmem:[#allocation5 + $0x98] sm:$0xf0]  ;;  %v2849_v18 = vor.u32 %v3892_v11, %v2846_v13  ;;  %v3891_v20 = vld [vmem:[#allocation5 + $0x4] sm:$0xf0]  ;;  %v2900_v21 = vld [vmem:[#allocation5 + $0x80] sm:$0xf] }
  0x41   :  { %406 = vmatpush.bf16.msra.mxu1 %v2925_v57  ;;  %v2913_v22 = vor.u32 %v3908_v14, %v2910_v15  ;;  %v3907_v23 = vld [vmem:[#allocation5 + $0x84] sm:$0xf0]  ;;  %v3890_v24 = vld [vmem:[#allocation5 + $0x4] sm:$0xf]  ;;  %v2838_v25 = vld [vmem:[#allocation5 + $0x8] sm:$0xf0]  ;;  %v2837_v28 = vor.u32 %v3891_v20, %v2836_v19 }
  0x42   :  { %419 = vmatpush.bf16.msra.mxu2 %v2865_v58  ;;  %v3906_v26 = vld [vmem:[#allocation5 + $0x84] sm:$0xf]  ;;  %v2902_v27 = vld [vmem:[#allocation5 + $0x88] sm:$0xf0]  ;;  %v193_v29 = vld [vmem:[#allocation2] sm:$0xff]  ;;  %v2901_v30 = vor.u32 %v3907_v23, %v2900_v21  ;;  %v2841_v31 = vor.u32 %v3890_v24, %v2838_v25  ;;  %v4494_v36 = vmov 8.0  }
  0x43   :  { %432 = vmatpush.bf16.msra.mxu3 %v2929_v62  ;;  %v194_v32 = vld [vmem:[#allocation2 + $0x8] sm:$0xff]  ;;  %v2905_v33 = vor.u32 %v3906_v26, %v2902_v27  ;;  %v227_v34 = vpack.c.bf16 %v193_v29, %v193_v29  ;;  %4178 = vrcp.f32 %v4494_v36  ;;  %v3020_v54 = vld [vmem:[#allocation7 + $0x70] sm:$0xf]  ;;  %v3936_v60 = vld [vmem:[#allocation7 + $0x74] sm:$0xf]  ;;  %vm508_vm6 = vcmask 1040384  }
  0x44   :  { %394 = vmatpush.bf16.msra.mxu0 %v2853_v4  ;;  %v228_v35 = vpack.c.bf16 %v194_v32, %v194_v32  ;;  %v3937_v55 = vld [vmem:[#allocation7 + $0x74] sm:$0xf0]  ;;  %v3084_v56 = vld [vmem:[#allocation7 + $0xf0] sm:$0xf]  ;;  %v3022_v63 = vld [vmem:[#allocation7 + $0x78] sm:$0xf0] }
  0x45   :  { %407 = vmatpush.bf16.msra.mxu1 %v2917_v7  ;;  %v3021_v58 = vor.u32 %v3937_v55, %v3020_v54  ;;  %v3953_v59 = vld [vmem:[#allocation7 + $0xf4] sm:$0xf0]  ;;  %v3952_v0 = vld [vmem:[#allocation7 + $0xf4] sm:$0xf]  ;;  %v3025_v3 = vor.u32 %v3936_v60, %v3022_v63  ;;  %v3086_v4 = vld [vmem:[#allocation7 + $0xf8] sm:$0xf0] }
  0x46   :  { %420 = vmatpush.bf16.msra.mxu2 %v2857_v8  ;;  %v3085_v62 = vor.u32 %v3953_v59, %v3084_v56  ;;  %v3089_v6 = vor.u32 %v3952_v0, %v3086_v4  ;;  %v3012_v7 = vld [vmem:[#allocation7 + $0x60] sm:$0xf]  ;;  %v3935_v8 = vld [vmem:[#allocation7 + $0x64] sm:$0xf0]  ;;  %v3934_v14 = vld [vmem:[#allocation7 + $0x64] sm:$0xf] }
  0x47   :  { %433 = vmatpush.bf16.msra.mxu3 %v2921_v12  ;;  %v3076_v9 = vld [vmem:[#allocation7 + $0xe0] sm:$0xf]  ;;  %v3013_v12 = vor.u32 %v3935_v8, %v3012_v7  ;;  %v3951_v13 = vld [vmem:[#allocation7 + $0xe4] sm:$0xf0]  ;;  %v3950_v19 = vld [vmem:[#allocation7 + $0xe4] sm:$0xf] }
  0x48   :  { %395 = vmatpush.bf16.msra.mxu0 %v2845_v16  ;;  %v3078_v20 = vld [vmem:[#allocation7 + $0xe8] sm:$0xf0]  ;;  %v3004_v25 = vld [vmem:[#allocation7 + $0x50] sm:$0xf]  ;;  %v3933_v26 = vld [vmem:[#allocation7 + $0x54] sm:$0xf0] }
  0x49   :  { %408 = vmatpush.bf16.msra.mxu1 %v2909_v17  ;;  %v4179_v37 = vpop.eup %4178  ;;  %v3077_v17 = vor.u32 %v3951_v13, %v3076_v9  ;;  %v3081_v23 = vor.u32 %v3950_v19, %v3078_v20  ;;  %v3068_v27 = vld [vmem:[#allocation7 + $0xd0] sm:$0xf]  ;;  %v3005_v29 = vor.u32 %v3933_v26, %v3004_v25  ;;  %v3070_v36 = vld [vmem:[#allocation7 + $0xd8] sm:$0xf0]  ;;  %v3929_v59 = vld [vmem:[#allocation7 + $0x34] sm:$0xf0] }
  0x4a   :  { %421 = vmatpush.bf16.msra.mxu2 %v2849_v18  ;;  %v457_v38 = vmul.f32 8.0, %v4179_v37  ;;  %vm461_vm0 = vweird.f32 %v4179_v37  ;;  %v3014_v18 = vld [vmem:[#allocation7 + $0x68] sm:$0xf0]  ;;  %v3945_v63 = vld [vmem:[#allocation7 + $0xb4] sm:$0xf0]  ;;  %s4495_s4 = smov [#allocation19]  }
  0x4b   :  { %434 = vmatpush.bf16.msra.mxu3 %v2913_v22  ;;  %v3017_v22 = vor.u32 %v3934_v14, %v3014_v18  ;;  %v3928_v0 = vld [vmem:[#allocation7 + $0x34] sm:$0xf]  ;;  %v3044_v14 = vld [vmem:[#allocation7 + $0xa0] sm:$0xf]  ;;  %v3926_v18 = vld [vmem:[#allocation7 + $0x24] sm:$0xf] }
  0x4c   :  { %396 = vmatpush.bf16.msra.mxu0 %v2837_v28  ;;  %v458_v41 = vsub.f32 1.0, %v457_v38  ;;  %v3944_v4 = vld [vmem:[#allocation7 + $0xb4] sm:$0xf]  ;;  %v2982_v19 = vld [vmem:[#allocation7 + $0x28] sm:$0xf0]  ;;  %s2817_s5 = sshll.u32 %s4495_s4, 4  ;;  %s2818_s5 = int_to_ptr.vmem [resolvable:$true] %s2817_s5 }
  0x4d   :  { %409 = vmatpush.bf16.msra.mxu1 %v2901_v30  ;;  %v3949_v30 = vld [vmem:[#allocation7 + $0xd4] sm:$0xf0]  ;;  %v3942_v20 = vld [vmem:[#allocation7 + $0xa4] sm:$0xf]  ;;  %s2819_s6 = sshll.u32 %s4824_s11, 4  ;;  %s2820_s6 = int_to_ptr.hbm [resolvable:$true] %s2819_s6 }
  0x4e   :  { %422 = vmatpush.bf16.msra.mxu2 %v2841_v31  ;;  %v459_v44 = vmul.f32 %v4179_v37, %v458_v41  ;;  %v3932_v31 = vld [vmem:[#allocation7 + $0x54] sm:$0xf]  ;;  %v2996_v41 = vld [vmem:[#allocation7 + $0x40] sm:$0xf] }
  0x4f   :  { %435 = vmatpush.bf16.msra.mxu3 %v2905_v33  ;;  %397 = vmatmul.bf16.vlgmr.msra.gmra.mxu0 %v227_v34  ;;  %v3069_v33 = vor.u32 %v3949_v30, %v3068_v27  ;;  %v2972_v27 = vld [vmem:[#allocation7 + $0x10] sm:$0xf] }
  0x50   :  { %410 = vmatmul.bf16.vlgmr.msra.gmra.mxu1 %v228_v35  ;;  %v460_v50 = vadd.f32 %v4179_v37, %v459_v44  ;;  %720 = vmatpush.bf16.msrb.mxu0 %v3021_v58  ;;  %v2988_v58 = vld [vmem:[#allocation7 + $0x30] sm:$0xf] }
  0x51   :  { %423 = vmatmul.bf16.vlgmr.msra.gmra.mxu2 %v227_v34  ;;  %733 = vmatpush.bf16.msrb.mxu1 %v3085_v62  ;;  %v3006_v34 = vld [vmem:[#allocation7 + $0x58] sm:$0xf0]  ;;  %v3052_v62 = vld [vmem:[#allocation7 + $0xb0] sm:$0xf] }
  0x52   :  { %436 = vmatmul.bf16.vlgmr.msra.gmra.mxu3 %v228_v35  ;;  %v4613_v1 = vsel %vm461_vm0, %v4179_v37, %v460_v50  ;;  %746 = vmatpush.bf16.msrb.mxu2 %v3025_v3  ;;  %v3948_v35 = vld [vmem:[#allocation7 + $0xd4] sm:$0xf]  ;;  %v3009_v38 = vor.u32 %v3932_v31, %v3006_v34  ;;  %v2998_v50 = vld [vmem:[#allocation7 + $0x48] sm:$0xf0]  ;;  %v3053_v3 = vor.u32 %v3945_v63, %v3052_v62  ;;  %v2974_v34 = vld [vmem:[#allocation7 + $0x18] sm:$0xf0] }
  0x53   :  { %759 = vmatpush.bf16.msrb.mxu3 %v3089_v6 }
  0x54   :  { %721 = vmatpush.bf16.msrb.mxu0 %v3013_v12 }
  0x55   :  { %734 = vmatpush.bf16.msrb.mxu1 %v3077_v17 }
  0x56   :  { %747 = vmatpush.bf16.msrb.mxu2 %v3017_v22  ;;  %v2985_v22 = vor.u32 %v3926_v18, %v2982_v19 }
  0x57   :  { %760 = vmatpush.bf16.msrb.mxu3 %v3081_v23  ;;  %v3046_v23 = vld [vmem:[#allocation7 + $0xa8] sm:$0xf0] }
  0x58   :  { %722 = vmatpush.bf16.msrb.mxu0 %v3005_v29  ;;  %v3049_v26 = vor.u32 %v3942_v20, %v3046_v23  ;;  %v3036_v29 = vld [vmem:[#allocation7 + $0x90] sm:$0xf] }
  0x59   :  { %735 = vmatpush.bf16.msrb.mxu1 %v3069_v33  ;;  %v3924_v33 = vld [vmem:[#allocation7 + $0x14] sm:$0xf] }
  0x5a   :  { %748 = vmatpush.bf16.msrb.mxu2 %v3009_v38  ;;  %v3940_v38 = vld [vmem:[#allocation7 + $0x94] sm:$0xf] }
  0xcc   :  { %v398_v39 = vpop.f32.mrf.mxu0 }
  0xcd   :  { %v411_v40 = vpop.f32.mrf.mxu1 }
  0xce   :  { %v412_v42 = vadd.f32 %v411_v40, %v398_v39  ;;  %v3073_v39 = vor.u32 %v3948_v35, %v3070_v36 }
  0xd0   :  { %v444_v43 = vrot.slane %v412_v42, 4  ;;  %761 = vmatpush.bf16.msrb.mxu3 %v3073_v39  ;;  %v3038_v39 = vld [vmem:[#allocation7 + $0x98] sm:$0xf0] }
  0xd2   :  { %v445_v45 = vadd.f32 %v444_v43, %v412_v42 }
  0xd4   :  { %v424_v46 = vpop.f32.mrf.mxu2  ;;  %v446_v47 = vrot.slane %v445_v45, 2  ;;  %v400_v49 = vpop.f32.mrf.mxu0 }
  0xd5   :  { %v437_v48 = vpop.f32.mrf.mxu3  ;;  %v413_v52 = vpop.f32.mrf.mxu1 }
  0xd6   :  { %v4610_v51 = vadd.f32 %v437_v48, %v424_v46  ;;  %v447_v53 = vadd.f32 %v446_v47, %v445_v45  ;;  %v3060_v45 = vld [vmem:[#allocation7 + $0xc0] sm:$0xf]  ;;  %v3947_v46 = vld [vmem:[#allocation7 + $0xc4] sm:$0xf0]  ;;  %v3930_v47 = vld [vmem:[#allocation7 + $0x44] sm:$0xf] }
  0xd7   :  { %v3061_v49 = vor.u32 %v3947_v46, %v3060_v45  ;;  %v3946_v52 = vld [vmem:[#allocation7 + $0xc4] sm:$0xf]  ;;  %v3001_v55 = vor.u32 %v3930_v47, %v2998_v50  ;;  %v3939_v47 = vld [vmem:[#allocation7 + $0x84] sm:$0xf0] }
  0xd8   :  { %v450_v57 = vrot.slane %v4610_v51, 4  ;;  %v448_v61 = vrot.slane %v447_v53, 1 }
  0xd9   :  { %736 = vmatpush.bf16.msrb.mxu1 %v3061_v49  ;;  %749 = vmatpush.bf16.msrb.mxu2 %v3001_v55  ;;  %v2966_v49 = vld [vmem:[#allocation7 + $0x8] sm:$0xf0] }
  0xda   :  { %v451_v2 = vadd.f32 %v450_v57, %v4610_v51  ;;  %v449_v5 = vadd.f32 %v448_v61, %v447_v53  ;;  %v3062_v53 = vld [vmem:[#allocation7 + $0xc8] sm:$0xf0]  ;;  %v2989_v61 = vor.u32 %v3929_v59, %v2988_v58 }
  0xdb   :  { %v3065_v56 = vor.u32 %v3946_v52, %v3062_v53  ;;  %v3938_v53 = vld [vmem:[#allocation7 + $0x84] sm:$0xf]  ;;  %v3030_v55 = vld [vmem:[#allocation7 + $0x88] sm:$0xf0] }
  0xdc   :  { %v452_v10 = vrot.slane %v451_v2, 2  ;;  %v426_v11 = vpop.f32.mrf.mxu2  ;;  %v463_v15 = vmul.f32 %v4613_v1, %v449_v5  ;;  %v3054_v5 = vld [vmem:[#allocation7 + $0xb8] sm:$0xf0] }
  0xdd   :  { %v439_v16 = vpop.f32.mrf.mxu3  ;;  %762 = vmatpush.bf16.msrb.mxu3 %v3065_v56  ;;  %v3057_v8 = vor.u32 %v3944_v4, %v3054_v5  ;;  %737 = vmatpush.bf16.msrb.mxu1 %v3053_v3  ;;  %v3927_v11 = vld [vmem:[#allocation7 + $0x24] sm:$0xf0] }
  0xde   :  { %v453_v21 = vadd.f32 %v452_v10, %v451_v2  ;;  %v4617_v24 = vsub.f32 %v412_v42, %v463_v15  ;;  %v3931_v42 = vld [vmem:[#allocation7 + $0x44] sm:$0xf0]  ;;  %v2980_v10 = vld [vmem:[#allocation7 + $0x20] sm:$0xf] }
  0xdf   :  { %v2997_v44 = vor.u32 %v3931_v42, %v2996_v41  ;;  %v2981_v13 = vor.u32 %v3927_v11, %v2980_v10  ;;  %v3943_v15 = vld [vmem:[#allocation7 + $0xa4] sm:$0xf0]  ;;  %v3041_v41 = vor.u32 %v3940_v38, %v3038_v39  ;;  %v2964_v42 = vld [vmem:[#allocation7] sm:$0xf]  ;;  %v3969_v38 = vld [vmem:[#allocation8 + $0x74] sm:$0xf0] }
  0xe0   :  { %v454_v28 = vrot.slane %v453_v21, 1  ;;  %v467_v32 = vmul.f32 %v4617_v24, %v4617_v24  ;;  %v3045_v17 = vor.u32 %v3943_v15, %v3044_v14 }
  0xe1   :  { %723 = vmatpush.bf16.msrb.mxu0 %v2997_v44  ;;  %763 = vmatpush.bf16.msrb.mxu3 %v3057_v8  ;;  %v3028_v44 = vld [vmem:[#allocation7 + $0x80] sm:$0xf] }
  0xe2   :  { %v455_v37 = vadd.f32 %v454_v28, %v453_v21  ;;  %v469_v40 = vrot.slane %v467_v32, 4  ;;  %738 = vmatpush.bf16.msrb.mxu1 %v3045_v17  ;;  %v3925_v28 = vld [vmem:[#allocation7 + $0x14] sm:$0xf0]  ;;  %v3029_v50 = vor.u32 %v3939_v47, %v3028_v44  ;;  %v441_v8 = vld [vmem:[#allocation17] ss:$8 sm:$0x3] }
  0xe3   :  { %v2973_v31 = vor.u32 %v3925_v28, %v2972_v27  ;;  %v3968_v44 = vld [vmem:[#allocation8 + $0x74] sm:$0xf] }
  0xe4   :  { %v464_v43 = vmul.f32 %v4613_v1, %v455_v37  ;;  %v470_v48 = vadd.f32 %v469_v40, %v467_v32  ;;  %v3941_v32 = vld [vmem:[#allocation7 + $0x94] sm:$0xf0]  ;;  %v2977_v37 = vor.u32 %v3924_v33, %v2974_v34 }
  0xe5   :  { %724 = vmatpush.bf16.msrb.mxu0 %v2989_v61  ;;  %764 = vmatpush.bf16.msrb.mxu3 %v3049_v26  ;;  %v3037_v36 = vor.u32 %v3941_v32, %v3036_v29 }
  0xe6   :  { %v4623_v54 = vsub.f32 %v4610_v51, %v464_v43  ;;  %v471_v57 = vrot.slane %v470_v48, 2  ;;  %v2990_v51 = vld [vmem:[#allocation7 + $0x38] sm:$0xf0]  ;;  %v3923_v43 = vld [vmem:[#allocation7 + $0x4] sm:$0xf0] }
  0xe7   :  { %v2993_v7 = vor.u32 %v3928_v0, %v2990_v51  ;;  %739 = vmatpush.bf16.msrb.mxu1 %v3037_v36  ;;  %v2965_v46 = vor.u32 %v3923_v43, %v2964_v42  ;;  %v3985_v43 = vld [vmem:[#allocation8 + $0xf4] sm:$0xf0] }
  0xe8   :  { %v468_v60 = vmul.f32 %v4623_v54, %v4623_v54  ;;  %v472_v2 = vadd.f32 %v471_v57, %v470_v48  ;;  %v3922_v48 = vld [vmem:[#allocation7 + $0x4] sm:$0xf]  ;;  %v3033_v57 = vor.u32 %v3938_v53, %v3030_v55 }
  0xe9   :  { %750 = vmatpush.bf16.msrb.mxu2 %v2993_v7  ;;  %725 = vmatpush.bf16.msrb.mxu0 %v2981_v13  ;;  %v2969_v52 = vor.u32 %v3922_v48, %v2966_v49  ;;  %v3984_v49 = vld [vmem:[#allocation8 + $0xf4] sm:$0xf] }
  0xea   :  { %v475_v6 = vrot.slane %v468_v60, 4  ;;  %v473_v9 = vrot.slane %v472_v2, 1  ;;  %765 = vmatpush.bf16.msrb.mxu3 %v3041_v41  ;;  %v3212_v41 = vld [vmem:[#allocation8 + $0xf0] sm:$0xf] }
  0xeb   :  { %740 = vmatpush.bf16.msrb.mxu1 %v3029_v50  ;;  %v3213_v47 = vor.u32 %v3985_v43, %v3212_v41  ;;  %v3214_v50 = vld [vmem:[#allocation8 + $0xf8] sm:$0xf0]  ;;  %v3961_v43 = vld [vmem:[#allocation8 + $0x34] sm:$0xf0] }
  0xec   :  { %v476_v12 = vadd.f32 %v475_v6, %v468_v60  ;;  %v474_v16 = vadd.f32 %v473_v9, %v472_v2 }
  0xed   :  { %751 = vmatpush.bf16.msrb.mxu2 %v2985_v22  ;;  %726 = vmatpush.bf16.msrb.mxu0 %v2973_v31 }
  0xee   :  { %v477_v21 = vrot.slane %v476_v12, 2  ;;  %v481_v25 = vmul.f32 %v474_v16, %v4613_v1  ;;  %766 = vmatpush.bf16.msrb.mxu3 %v3033_v57  ;;  %v3140_v57 = vld [vmem:[#allocation8 + $0x60] sm:$0xf] }
  0xef   :  { %1059 = vmatpush.bf16.msra.mxu1 %v3213_v47  ;;  %v3977_v47 = vld [vmem:[#allocation8 + $0xb4] sm:$0xf0] }
  0xf0   :  { %v478_v30 = vadd.f32 %v477_v21, %v476_v12  ;;  %v483_v35 = vadd.f32 1e-05, %v481_v25  ;;  %v443_v12 = vld [vmem:[#allocation17 + $0x1] ss:$8 sm:$0x3] }
  0xf1   :  { %752 = vmatpush.bf16.msrb.mxu2 %v2977_v37  ;;  %727 = vmatpush.bf16.msrb.mxu0 %v2965_v46  ;;  %v520_v16 = vperm.slane %v443_v12, 0  ;;  %v521_v17 = vperm.slane %v443_v12, 1  ;;  %v3148_v37 = vld [vmem:[#allocation8 + $0x70] sm:$0xf] }
  0xf2   :  { %v479_v40 = vrot.slane %v478_v30, 1  ;;  %4180 = vrsqrt.f32 %v483_v35  ;;  %vm491_vm5 = vweird.f32 %v483_v35 }
  0xf4   :  { %v480_v45 = vadd.f32 %v479_v40, %v478_v30  ;;  %v3149_v40 = vor.u32 %v3969_v38, %v3148_v37  ;;  %v3978_v38 = vld [vmem:[#allocation8 + $0xc4] sm:$0xf] }
  0xf5   :  { %753 = vmatpush.bf16.msrb.mxu2 %v2969_v52 }
  0xf6   :  { %v482_v56 = vmul.f32 %v480_v45, %v4613_v1  ;;  %v3150_v45 = vld [vmem:[#allocation8 + $0x78] sm:$0xf0]  ;;  %1046 = vmatpush.bf16.msra.mxu0 %v3149_v40 }
  0xf7   :  { %v3153_v48 = vor.u32 %v3968_v44, %v3150_v45  ;;  %v3180_v44 = vld [vmem:[#allocation8 + $0xb0] sm:$0xf] }
  0xf8   :  { %v484_v58 = vadd.f32 1e-05, %v482_v56  ;;  %v4181_v59 = vpop.eup %4180  ;;  %v3217_v56 = vor.u32 %v3984_v49, %v3214_v50  ;;  %v3181_v50 = vor.u32 %v3977_v47, %v3180_v44  ;;  %v4001_v47 = vld [vmem:[#allocation7 + $0x174] sm:$0xf0] }
  0xf9   :  { %v486_v60 = vmul.f32 %v4181_v59, %v483_v35  ;;  %vm492_vm2 = vweird.f32 %v4181_v59  ;;  %1072 = vmatpush.bf16.msra.mxu2 %v3153_v48  ;;  %v3960_v48 = vld [vmem:[#allocation8 + $0x34] sm:$0xf] }
  0xfa   :  { %4182 = vrsqrt.f32 %v484_v58  ;;  %vm501_vm3 = vweird.f32 %v484_v58  ;;  %vm493_vm7 = vmor %vm491_vm5, %vm492_vm2  ;;  %1085 = vmatpush.bf16.msra.mxu3 %v3217_v56 }
  0xfb   :  { %v487_v61 = vmul.f32 %v4181_v59, %v486_v60 }
  0xfd   :  { %v488_v63 = vmul.f32 0.5, %v487_v61 }
  0xff   :  { %v489_v3 = vsub.f32 1.5, %v488_v63  ;;  %v3966_v63 = vld [vmem:[#allocation8 + $0x64] sm:$0xf] }
 0x100   :  { %v4183_v62 = vpop.eup %4182 }
 0x101   :  { %v496_v0 = vmul.f32 %v4183_v62, %v484_v58  ;;  %vm502_vm1 = vweird.f32 %v4183_v62  ;;  %v490_v5 = vmul.f32 %v4181_v59, %v489_v3  ;;  %v3967_v58 = vld [vmem:[#allocation8 + $0x64] sm:$0xf0] }
 0x102   :  { %vm503_vm4 = vmor %vm501_vm3, %vm502_vm1  ;;  %v3141_v61 = vor.u32 %v3967_v58, %v3140_v57  ;;  %v3182_v57 = vld [vmem:[#allocation8 + $0xb8] sm:$0xf0] }
 0x103   :  { %v497_v2 = vmul.f32 %v4183_v62, %v496_v0  ;;  %v494_v10 = vsel %vm493_vm7, %v4181_v59, %v490_v5  ;;  %v3204_v59 = vld [vmem:[#allocation8 + $0xe0] sm:$0xf]  ;;  %v3142_v0 = vld [vmem:[#allocation8 + $0x68] sm:$0xf0] }
 0x104   :  { %v3206_v5 = vld [vmem:[#allocation8 + $0xe8] sm:$0xf0]  ;;  %1047 = vmatpush.bf16.msra.mxu0 %v3141_v61  ;;  %v3959_v61 = vld [vmem:[#allocation8 + $0x24] sm:$0xf0] }
 0x105   :  { %v498_v51 = vmul.f32 0.5, %v497_v2 }
 0x107   :  { %v499_v4 = vsub.f32 1.5, %v498_v51  ;;  %v3145_v51 = vor.u32 %v3966_v63, %v3142_v0 }
 0x109   :  { %v500_v6 = vmul.f32 %v4183_v62, %v499_v4  ;;  %v3982_v4 = vld [vmem:[#allocation8 + $0xe4] sm:$0xf]  ;;  %1073 = vmatpush.bf16.msra.mxu2 %v3145_v51 }
 0x10a   :  { %v3958_v51 = vld [vmem:[#allocation8 + $0x24] sm:$0xf] }
 0x10b   :  { %v504_v7 = vsel %vm503_vm4, %v4183_v62, %v500_v6  ;;  %v3983_v62 = vld [vmem:[#allocation8 + $0xe4] sm:$0xf0] }
 0x10c   :  { %v507_v9 = vrot.slane %v504_v7, 7  ;;  %v3205_v3 = vor.u32 %v3983_v62, %v3204_v59  ;;  %v3209_v7 = vor.u32 %v3982_v4, %v3206_v5  ;;  %v3172_v62 = vld [vmem:[#allocation8 + $0xa0] sm:$0xf] }
 0x10e   :  { %v509_v11 = vsel %vm508_vm6, %v494_v10, %v507_v9  ;;  %v3132_v9 = vld [vmem:[#allocation8 + $0x50] sm:$0xf]  ;;  %v3965_v10 = vld [vmem:[#allocation8 + $0x54] sm:$0xf0]  ;;  %1060 = vmatpush.bf16.msra.mxu1 %v3205_v3  ;;  %1086 = vmatpush.bf16.msra.mxu3 %v3209_v7  ;;  %v3975_v3 = vld [vmem:[#allocation8 + $0xa4] sm:$0xf0] }
 0x10f   :  { %v511_v13 = vmul.f32 %v509_v11, %v441_v8  ;;  %v3196_v11 = vld [vmem:[#allocation8 + $0xd0] sm:$0xf]  ;;  %v3173_v5 = vor.u32 %v3975_v3, %v3172_v62  ;;  %v3974_v7 = vld [vmem:[#allocation8 + $0xa4] sm:$0xf] }
 0x111   :  { %v514_v14 = vperm.slane %v511_v13, 1  ;;  %v513_v15 = vperm.slane %v511_v13, 0  ;;  %v3133_v13 = vor.u32 %v3965_v10, %v3132_v9 }
 0x113   :  { %v518_v18 = vmul.f32 %v514_v14, %v4623_v54  ;;  %v517_v19 = vmul.f32 %v513_v15, %v4617_v24  ;;  %v3981_v14 = vld [vmem:[#allocation8 + $0xd4] sm:$0xf0]  ;;  %v3964_v15 = vld [vmem:[#allocation8 + $0x54] sm:$0xf]  ;;  %1048 = vmatpush.bf16.msra.mxu0 %v3133_v13  ;;  %v3100_v13 = vld [vmem:[#allocation8 + $0x10] sm:$0xf] }
 0x115   :  { %v4632_v20 = vadd.f32 %v520_v16, %v517_v19  ;;  %v4634_v21 = vadd.f32 %v521_v17, %v518_v18  ;;  %v3134_v16 = vld [vmem:[#allocation8 + $0x58] sm:$0xf0]  ;;  %v3197_v18 = vor.u32 %v3981_v14, %v3196_v11  ;;  %v3957_v14 = vld [vmem:[#allocation8 + $0x14] sm:$0xf0] }
 0x116   :  { %v3137_v19 = vor.u32 %v3964_v15, %v3134_v16  ;;  %v3101_v16 = vor.u32 %v3957_v14, %v3100_v13 }
 0x117   :  { %v558_v22 = vpack.c.bf16 %v4632_v20, %v4632_v20  ;;  %v559_v23 = vpack.c.bf16 %v4634_v21, %v4634_v21  ;;  %1061 = vmatpush.bf16.msra.mxu1 %v3197_v18  ;;  %v3973_v18 = vld [vmem:[#allocation8 + $0x94] sm:$0xf0] }
 0x118   :  { %1074 = vmatpush.bf16.msra.mxu2 %v3137_v19 }
 0x119   :  { %728 = vmatmul.bf16.vlgmr.msrb.gmra.mxu0 %v558_v22  ;;  %741 = vmatmul.bf16.vlgmr.msrb.gmra.mxu1 %v559_v23 }
 0x11a   :  { %754 = vmatmul.bf16.vlgmr.msrb.gmra.mxu2 %v558_v22  ;;  %767 = vmatmul.bf16.vlgmr.msrb.gmra.mxu3 %v559_v23  ;;  %v3980_v22 = vld [vmem:[#allocation8 + $0xd4] sm:$0xf]  ;;  %v3198_v23 = vld [vmem:[#allocation8 + $0xd8] sm:$0xf0] }
 0x196   :  { %v729_v25 = vpop.f32.mrf.mxu0  ;;  %v742_v26 = vpop.f32.mrf.mxu1 }
 0x197   :  { %v743_v27 = vadd.f32 %v742_v26, %v729_v25  ;;  %v3201_v26 = vor.u32 %v3980_v22, %v3198_v23  ;;  %v3956_v22 = vld [vmem:[#allocation8 + $0x14] sm:$0xf]  ;;  %v3102_v23 = vld [vmem:[#allocation8 + $0x18] sm:$0xf0] }
 0x199   :  { %v776_v54 = vrot.slane %v743_v27, 4  ;;  %1087 = vmatpush.bf16.msra.mxu3 %v3201_v26 }
 0x19b   :  { %v777_v28 = vadd.f32 %v776_v54, %v743_v27  ;;  %v3124_v54 = vld [vmem:[#allocation8 + $0x40] sm:$0xf] }
 0x19d   :  { %v778_v24 = vrot.slane %v777_v28, 2  ;;  %v755_v29 = vpop.f32.mrf.mxu2  ;;  %v768_v30 = vpop.f32.mrf.mxu3 }
 0x19e   :  { %v4640_v31 = vadd.f32 %v768_v30, %v755_v29  ;;  %v731_v32 = vpop.f32.mrf.mxu0  ;;  %v744_v33 = vpop.f32.mrf.mxu1 }
 0x19f   :  { %v779_v34 = vadd.f32 %v778_v24, %v777_v28  ;;  %v3963_v28 = vld [vmem:[#allocation8 + $0x44] sm:$0xf0]  ;;  %v3188_v24 = vld [vmem:[#allocation8 + $0xc0] sm:$0xf]  ;;  %v3962_v33 = vld [vmem:[#allocation8 + $0x44] sm:$0xf] }
 0x1a0   :  { %v782_v35 = vrot.slane %v4640_v31, 4  ;;  %v3125_v30 = vor.u32 %v3963_v28, %v3124_v54  ;;  %v3979_v32 = vld [vmem:[#allocation8 + $0xc4] sm:$0xf0]  ;;  %v3166_v54 = vld [vmem:[#allocation8 + $0x98] sm:$0xf0] }
 0x1a1   :  { %v780_v36 = vrot.slane %v779_v34, 1  ;;  %v3092_v28 = vld [vmem:[#allocation8] sm:$0xf] }
 0x1a2   :  { %v783_v39 = vadd.f32 %v782_v35, %v4640_v31  ;;  %1049 = vmatpush.bf16.msra.mxu0 %v3125_v30 }
 0x1a3   :  { %v781_v42 = vadd.f32 %v780_v36, %v779_v34  ;;  %v3126_v34 = vld [vmem:[#allocation8 + $0x48] sm:$0xf0]  ;;  %v3189_v36 = vor.u32 %v3979_v32, %v3188_v24  ;;  %v3955_v24 = vld [vmem:[#allocation8 + $0x4] sm:$0xf0] }
 0x1a4   :  { %v784_v46 = vrot.slane %v783_v39, 2  ;;  %v3129_v37 = vor.u32 %v3962_v33, %v3126_v34  ;;  %v3093_v32 = vor.u32 %v3955_v24, %v3092_v28  ;;  %v3156_v33 = vld [vmem:[#allocation8 + $0x80] sm:$0xf]  ;;  %v3971_v34 = vld [vmem:[#allocation8 + $0x84] sm:$0xf0] }
 0x1a5   :  { %v788_v52 = vmul.f32 %v781_v42, %v4613_v1  ;;  %v757_v53 = vpop.f32.mrf.mxu2  ;;  %v770_v55 = vpop.f32.mrf.mxu3  ;;  %1062 = vmatpush.bf16.msra.mxu1 %v3189_v36  ;;  %v3324_v28 = vld [vmem:[#allocation7 + $0x1d0] sm:$0xf]  ;;  %v4013_v24 = vld [vmem:[#allocation7 + $0x1d4] sm:$0xf0] }
 0x1a6   :  { %v785_v60 = vadd.f32 %v784_v46, %v783_v39  ;;  %v3190_v39 = vld [vmem:[#allocation8 + $0xc8] sm:$0xf0]  ;;  %1075 = vmatpush.bf16.msra.mxu2 %v3129_v37  ;;  %v3976_v53 = vld [vmem:[#allocation8 + $0xb4] sm:$0xf]  ;;  %v3157_v37 = vor.u32 %v3971_v34, %v3156_v33  ;;  %v3326_v33 = vld [vmem:[#allocation7 + $0x1d8] sm:$0xf0] }
 0x1a7   :  { %v4645_v2 = vsub.f32 %v743_v27, %v788_v52  ;;  %v3193_v41 = vor.u32 %v3978_v38, %v3190_v39  ;;  %v3118_v52 = vld [vmem:[#allocation8 + $0x38] sm:$0xf0]  ;;  %v3185_v59 = vor.u32 %v3976_v53, %v3182_v57  ;;  %v3094_v38 = vld [vmem:[#allocation8 + $0x8] sm:$0xf0]  ;;  %v3970_v39 = vld [vmem:[#allocation8 + $0x84] sm:$0xf] }
 0x1a8   :  { %v786_v6 = vrot.slane %v785_v60, 1  ;;  %v3121_v56 = vor.u32 %v3960_v48, %v3118_v52  ;;  %v4000_v48 = vld [vmem:[#allocation7 + $0x174] sm:$0xf]  ;;  %v3268_v52 = vld [vmem:[#allocation7 + $0x160] sm:$0xf] }
 0x1a9   :  { %v792_v8 = vmul.f32 %v4645_v2, %v4645_v2  ;;  %1088 = vmatpush.bf16.msra.mxu3 %v3193_v41  ;;  %1063 = vmatpush.bf16.msra.mxu1 %v3181_v50  ;;  %v3278_v50 = vld [vmem:[#allocation7 + $0x178] sm:$0xf0]  ;;  %v3999_v53 = vld [vmem:[#allocation7 + $0x164] sm:$0xf0]  ;;  %v3270_v57 = vld [vmem:[#allocation7 + $0x168] sm:$0xf0] }
 0x1aa   :  { %v787_v12 = vadd.f32 %v786_v6, %v785_v60  ;;  %v3108_v60 = vld [vmem:[#allocation8 + $0x20] sm:$0xf]  ;;  %1076 = vmatpush.bf16.msra.mxu2 %v3121_v56  ;;  %v3110_v6 = vld [vmem:[#allocation8 + $0x28] sm:$0xf0]  ;;  %v3998_v56 = vld [vmem:[#allocation7 + $0x164] sm:$0xf] }
 0x1ab   :  { %v794_v17 = vrot.slane %v792_v8, 4  ;;  %v3109_v0 = vor.u32 %v3959_v61, %v3108_v60  ;;  %v3113_v10 = vor.u32 %v3958_v51, %v3110_v6  ;;  %v4017_v60 = vld [vmem:[#allocation7 + $0x1f4] sm:$0xf0]  ;;  %v4016_v61 = vld [vmem:[#allocation7 + $0x1f4] sm:$0xf] }
 0x1ac   :  { %v789_v25 = vmul.f32 %v787_v12, %v4613_v1  ;;  %v3342_v51 = vld [vmem:[#allocation7 + $0x1f8] sm:$0xf0] }
 0x1ad   :  { %v795_v27 = vadd.f32 %v794_v17, %v792_v8  ;;  %1089 = vmatpush.bf16.msra.mxu3 %v3185_v59  ;;  %v3174_v8 = vld [vmem:[#allocation8 + $0xa8] sm:$0xf0]  ;;  %1064 = vmatpush.bf16.msra.mxu1 %v3173_v5  ;;  %v3164_v17 = vld [vmem:[#allocation8 + $0x90] sm:$0xf]  ;;  %v3345_v6 = vor.u32 %v4016_v61, %v3342_v51 }
 0x1ae   :  { %v4651_v29 = vsub.f32 %v4640_v31, %v789_v25  ;;  %v3116_v31 = vld [vmem:[#allocation8 + $0x30] sm:$0xf]  ;;  %v3177_v11 = vor.u32 %v3974_v7, %v3174_v8  ;;  %1077 = vmatpush.bf16.msra.mxu2 %v3113_v10  ;;  %v3165_v19 = vor.u32 %v3973_v18, %v3164_v17  ;;  %v3972_v25 = vld [vmem:[#allocation8 + $0x94] sm:$0xf]  ;;  %v3997_v7 = vld [vmem:[#allocation7 + $0x154] sm:$0xf0] }
 0x1af   :  { %v796_v35 = vrot.slane %v795_v27, 2  ;;  %v3117_v46 = vor.u32 %v3961_v43, %v3116_v31  ;;  %v3169_v30 = vor.u32 %v3972_v25, %v3166_v54  ;;  %v3340_v59 = vld [vmem:[#allocation7 + $0x1f0] sm:$0xf]  ;;  %v3996_v8 = vld [vmem:[#allocation7 + $0x154] sm:$0xf] }
 0x1b0   :  { %v793_v40 = vmul.f32 %v4651_v29, %v4651_v29  ;;  %v3341_v3 = vor.u32 %v4017_v60, %v3340_v59  ;;  %v3332_v10 = vld [vmem:[#allocation7 + $0x1e0] sm:$0xf]  ;;  %v3334_v17 = vld [vmem:[#allocation7 + $0x1e8] sm:$0xf0]  ;;  %v3994_v25 = vld [vmem:[#allocation7 + $0x144] sm:$0xf] }
 0x1b1   :  { %v797_v42 = vadd.f32 %v796_v35, %v795_v27  ;;  %1050 = vmatpush.bf16.msra.mxu0 %v3117_v46  ;;  %1090 = vmatpush.bf16.msra.mxu3 %v3177_v11  ;;  %v3105_v27 = vor.u32 %v3956_v22, %v3102_v23  ;;  %v3954_v35 = vld [vmem:[#allocation8 + $0x4] sm:$0xf]  ;;  %v3276_v46 = vld [vmem:[#allocation7 + $0x170] sm:$0xf]  ;;  %v4015_v11 = vld [vmem:[#allocation7 + $0x1e4] sm:$0xf0] }
 0x1b2   :  { %v800_v45 = vrot.slane %v793_v40, 4  ;;  %1065 = vmatpush.bf16.msra.mxu1 %v3165_v19  ;;  %v3097_v41 = vor.u32 %v3954_v35, %v3094_v38  ;;  %v3252_v18 = vld [vmem:[#allocation7 + $0x140] sm:$0xf]  ;;  %v3995_v23 = vld [vmem:[#allocation7 + $0x144] sm:$0xf0] }
 0x1b3   :  { %v798_v49 = vrot.slane %v797_v42, 1  ;;  %1078 = vmatpush.bf16.msra.mxu2 %v3105_v27  ;;  %v3253_v35 = vor.u32 %v3995_v23, %v3252_v18  ;;  %v3993_v38 = vld [vmem:[#allocation7 + $0x134] sm:$0xf0]  ;;  %v775_v59 = vld [vmem:[#allocation17 + $0x4] ss:$8 sm:$0x3] }
 0x1b4   :  { %v801_v55 = vadd.f32 %v800_v45, %v793_v40  ;;  %v3158_v40 = vld [vmem:[#allocation8 + $0x88] sm:$0xf0]  ;;  %v3988_v23 = vld [vmem:[#allocation7 + $0x114] sm:$0xf] }
 0x1b5   :  { %v799_v58 = vadd.f32 %v798_v49, %v797_v42  ;;  %1051 = vmatpush.bf16.msra.mxu0 %v3109_v0  ;;  %1091 = vmatpush.bf16.msra.mxu3 %v3169_v30  ;;  %v3161_v42 = vor.u32 %v3970_v39, %v3158_v40  ;;  %v3277_v49 = vor.u32 %v4001_v47, %v3276_v46  ;;  %v3992_v40 = vld [vmem:[#allocation7 + $0x134] sm:$0xf]  ;;  %v3246_v46 = vld [vmem:[#allocation7 + $0x138] sm:$0xf0]  ;;  %v4010_v47 = vld [vmem:[#allocation7 + $0x1c4] sm:$0xf] }
 0x1b6   :  { %v802_v63 = vrot.slane %v801_v55, 2  ;;  %1066 = vmatpush.bf16.msra.mxu1 %v3157_v37  ;;  %v3273_v0 = vor.u32 %v3998_v56, %v3270_v57  ;;  %v3325_v30 = vor.u32 %v4013_v24, %v3324_v28  ;;  %v3244_v37 = vld [vmem:[#allocation7 + $0x130] sm:$0xf]  ;;  %v3249_v56 = vor.u32 %v3992_v40, %v3246_v46  ;;  %v4007_v28 = vld [vmem:[#allocation7 + $0x1a4] sm:$0xf0] }
 0x1b7   :  { %v806_v4 = vmul.f32 %v799_v58, %v4613_v1  ;;  %1079 = vmatpush.bf16.msra.mxu2 %v3097_v41  ;;  %v3269_v58 = vor.u32 %v3999_v53, %v3268_v52  ;;  %v3316_v41 = vld [vmem:[#allocation7 + $0x1c0] sm:$0xf]  ;;  %v3245_v52 = vor.u32 %v3993_v38, %v3244_v37  ;;  %v3222_v38 = vld [vmem:[#allocation7 + $0x108] sm:$0xf0]  ;;  %v3292_v40 = vld [vmem:[#allocation7 + $0x190] sm:$0xf] }
 0x1b8   :  { %v803_v9 = vadd.f32 %v802_v63, %v801_v55  ;;  %v3281_v55 = vor.u32 %v4000_v48, %v3278_v50  ;;  %v3318_v48 = vld [vmem:[#allocation7 + $0x1c8] sm:$0xf0] }
 0x1b9   :  { %v4656_v12 = vadd.f32 1e-05, %v806_v4  ;;  %1052 = vmatpush.bf16.msra.mxu0 %v3101_v16  ;;  %1092 = vmatpush.bf16.msra.mxu3 %v3161_v42  ;;  %v3260_v4 = vld [vmem:[#allocation7 + $0x150] sm:$0xf]  ;;  %v4014_v16 = vld [vmem:[#allocation7 + $0x1e4] sm:$0xf]  ;;  %v3321_v53 = vor.u32 %v4010_v47, %v3318_v48 }
 0x1ba   :  { %v804_v15 = vrot.slane %v803_v9, 1  ;;  %1319 = vmatpush.bf16.msrb.mxu1 %v3341_v3  ;;  %v3261_v14 = vor.u32 %v3997_v7, %v3260_v4  ;;  %v3337_v22 = vor.u32 %v4014_v16, %v3334_v17  ;;  %v4011_v42 = vld [vmem:[#allocation7 + $0x1c4] sm:$0xf0]  ;;  %v4008_v16 = vld [vmem:[#allocation7 + $0x1b4] sm:$0xf] }
 0x1bb   :  { %4184 = vrsqrt.f32 %v4656_v12  ;;  %1332 = vmatpush.bf16.msrb.mxu2 %v3281_v55  ;;  %vm816_vm12 = vweird.f32 %v4656_v12  ;;  %v773_v55 = vld [vmem:[#allocation17 + $0x2] ss:$8 sm:$0x3]  ;;  %v3310_v17 = vld [vmem:[#allocation7 + $0x1b8] sm:$0xf0] }
 0x1bc   :  { %v805_v26 = vadd.f32 %v804_v15, %v803_v9  ;;  %v3262_v9 = vld [vmem:[#allocation7 + $0x158] sm:$0xf0]  ;;  %v3333_v15 = vor.u32 %v4015_v11, %v3332_v10  ;;  %v3990_v10 = vld [vmem:[#allocation7 + $0x124] sm:$0xf]  ;;  %v3313_v18 = vor.u32 %v4008_v16, %v3310_v17  ;;  %v3284_v47 = vld [vmem:[#allocation7 + $0x180] sm:$0xf] }
 0x1bd   :  { %1053 = vmatpush.bf16.msra.mxu0 %v3093_v32  ;;  %1345 = vmatpush.bf16.msrb.mxu3 %v3345_v6  ;;  %v3265_v19 = vor.u32 %v3996_v8, %v3262_v9  ;;  %v4012_v32 = vld [vmem:[#allocation7 + $0x1d4] sm:$0xf]  ;;  %v3236_v8 = vld [vmem:[#allocation7 + $0x120] sm:$0xf]  ;;  %v3991_v9 = vld [vmem:[#allocation7 + $0x124] sm:$0xf0] }
 0x1be   :  { %v807_v36 = vmul.f32 %v805_v26, %v4613_v1  ;;  %v3254_v26 = vld [vmem:[#allocation7 + $0x148] sm:$0xf0]  ;;  %1320 = vmatpush.bf16.msrb.mxu1 %v3333_v15  ;;  %v3237_v11 = vor.u32 %v3991_v9, %v3236_v8  ;;  %v3308_v15 = vld [vmem:[#allocation7 + $0x1b0] sm:$0xf]  ;;  %v4003_v48 = vld [vmem:[#allocation7 + $0x184] sm:$0xf0] }
 0x1bf   :  { %1333 = vmatpush.bf16.msrb.mxu2 %v3273_v0  ;;  %v3257_v39 = vor.u32 %v3994_v25, %v3254_v26  ;;  %v3230_v26 = vld [vmem:[#allocation7 + $0x118] sm:$0xf0] }
 0x1c0   :  { %v4660_v31 = vadd.f32 1e-05, %v807_v36  ;;  %v3329_v36 = vor.u32 %v4012_v32, %v3326_v33  ;;  %v3302_v32 = vld [vmem:[#allocation7 + $0x1a8] sm:$0xf0] }
 0x1c1   :  { %v4662_v43 = vpop.eup %4184  ;;  %1306 = vmatpush.bf16.msrb.mxu0 %v3277_v49  ;;  %1346 = vmatpush.bf16.msrb.mxu3 %v3337_v22  ;;  %v3317_v49 = vor.u32 %v4011_v42, %v3316_v41  ;;  %v3989_v22 = vld [vmem:[#allocation7 + $0x114] sm:$0xf0]  ;;  %v4004_v42 = vld [vmem:[#allocation7 + $0x194] sm:$0xf] }
 0x1c2   :  { %v811_v44 = vmul.f32 %v4662_v43, %v4656_v12  ;;  %4186 = vrsqrt.f32 %v4660_v31  ;;  %vm817_vm9 = vweird.f32 %v4662_v43  ;;  %vm826_vm10 = vweird.f32 %v4660_v31  ;;  %1321 = vmatpush.bf16.msrb.mxu1 %v3325_v30  ;;  %v4006_v30 = vld [vmem:[#allocation7 + $0x1a4] sm:$0xf]  ;;  %v4005_v41 = vld [vmem:[#allocation7 + $0x194] sm:$0xf0] }
 0x1c3   :  { %1334 = vmatpush.bf16.msrb.mxu2 %v3265_v19  ;;  %vm818_vm13 = vmor %vm816_vm12, %vm817_vm9  ;;  %v3228_v19 = vld [vmem:[#allocation7 + $0x110] sm:$0xf]  ;;  %v3305_v33 = vor.u32 %v4006_v30, %v3302_v32  ;;  %v4032_v30 = vld [vmem:[#allocation8 + $0x174] sm:$0xf] }
 0x1c4   :  { %v812_v45 = vmul.f32 %v4662_v43, %v811_v44  ;;  %v3229_v25 = vor.u32 %v3989_v22, %v3228_v19 }
 0x1c5   :  { %1307 = vmatpush.bf16.msrb.mxu0 %v3269_v58  ;;  %1347 = vmatpush.bf16.msrb.mxu3 %v3329_v36  ;;  %v3986_v36 = vld [vmem:[#allocation7 + $0x104] sm:$0xf] }
 0x1c6   :  { %v813_v63 = vmul.f32 0.5, %v812_v45  ;;  %1322 = vmatpush.bf16.msrb.mxu1 %v3317_v49  ;;  %v4002_v49 = vld [vmem:[#allocation7 + $0x184] sm:$0xf] }
 0x1c7   :  { %1335 = vmatpush.bf16.msrb.mxu2 %v3257_v39  ;;  %v3225_v39 = vor.u32 %v3986_v36, %v3222_v38  ;;  %v3470_v38 = vld [vmem:[#allocation8 + $0x1f8] sm:$0xf0] }
 0x1c8   :  { %v4668_v62 = vpop.eup %4186  ;;  %v814_v27 = vsub.f32 1.5, %v813_v63  ;;  %v845_v63 = vperm.slane %v775_v59, 1 }
 0x1c9   :  { %v821_v5 = vmul.f32 %v4668_v62, %v4660_v31  ;;  %vm827_vm8 = vweird.f32 %v4668_v62  ;;  %1308 = vmatpush.bf16.msrb.mxu0 %v3261_v14  ;;  %1348 = vmatpush.bf16.msrb.mxu3 %v3321_v53 }
 0x1ca   :  { %v815_v44 = vmul.f32 %v4662_v43, %v814_v27  ;;  %vm828_vm11 = vmor %vm826_vm10, %vm827_vm8  ;;  %v3233_v27 = vor.u32 %v3988_v23, %v3230_v26  ;;  %v3404_v23 = vld [vmem:[#allocation8 + $0x170] sm:$0xf] }
 0x1cb   :  { %v822_v13 = vmul.f32 %v4668_v62, %v821_v5  ;;  %1336 = vmatpush.bf16.msrb.mxu2 %v3249_v56  ;;  %v3468_v26 = vld [vmem:[#allocation8 + $0x1f0] sm:$0xf] }
 0x1cc   :  { %v819_v57 = vsel %vm818_vm13, %v4662_v43, %v815_v44  ;;  %v3293_v44 = vor.u32 %v4005_v41, %v3292_v40  ;;  %v3396_v41 = vld [vmem:[#allocation8 + $0x160] sm:$0xf] }
 0x1cd   :  { %v823_v54 = vmul.f32 0.5, %v822_v13  ;;  %1309 = vmatpush.bf16.msrb.mxu0 %v3253_v35  ;;  %v3238_v13 = vld [vmem:[#allocation7 + $0x128] sm:$0xf0]  ;;  %1349 = vmatpush.bf16.msrb.mxu3 %v3313_v18  ;;  %v3987_v35 = vld [vmem:[#allocation7 + $0x104] sm:$0xf0] }
 0x1ce   :  { %v3241_v14 = vor.u32 %v3990_v10, %v3238_v13 }
 0x1cf   :  { %v824_v34 = vsub.f32 1.5, %v823_v54  ;;  %v3300_v54 = vld [vmem:[#allocation7 + $0x1a0] sm:$0xf] }
 0x1d0   :  { %1337 = vmatpush.bf16.msrb.mxu2 %v3241_v14  ;;  %v3301_v24 = vor.u32 %v4007_v28, %v3300_v54 }
 0x1d1   :  { %v825_v45 = vmul.f32 %v4668_v62, %v824_v34  ;;  %1310 = vmatpush.bf16.msrb.mxu0 %v3245_v52  ;;  %v3220_v34 = vld [vmem:[#allocation7 + $0x100] sm:$0xf]  ;;  %1350 = vmatpush.bf16.msrb.mxu3 %v3305_v33  ;;  %v3286_v52 = vld [vmem:[#allocation7 + $0x188] sm:$0xf0]  ;;  %v3406_v33 = vld [vmem:[#allocation8 + $0x178] sm:$0xf0] }
 0x1d2   :  { %v3221_v37 = vor.u32 %v3987_v35, %v3220_v34  ;;  %v3289_v53 = vor.u32 %v4002_v49, %v3286_v52  ;;  %v3409_v36 = vor.u32 %v4032_v30, %v3406_v33  ;;  %v4030_v49 = vld [vmem:[#allocation8 + $0x164] sm:$0xf] }
 0x1d3   :  { %v829_v50 = vsel %vm828_vm11, %v4668_v62, %v825_v45  ;;  %v844_v62 = vperm.slane %v775_v59, 0  ;;  %v3294_v45 = vld [vmem:[#allocation7 + $0x198] sm:$0xf0] }
 0x1d4   :  { %v832_v31 = vrot.slane %v829_v50, 7  ;;  %1338 = vmatpush.bf16.msrb.mxu2 %v3233_v27  ;;  %v3297_v46 = vor.u32 %v4004_v42, %v3294_v45  ;;  %v3285_v50 = vor.u32 %v4003_v48, %v3284_v47  ;;  %v4031_v42 = vld [vmem:[#allocation8 + $0x164] sm:$0xf0] }
 0x1d5   :  { %1311 = vmatpush.bf16.msrb.mxu0 %v3237_v11  ;;  %v3397_v47 = vor.u32 %v4031_v42, %v3396_v41  ;;  %v4047_v48 = vld [vmem:[#allocation8 + $0x1e4] sm:$0xf0] }
 0x1d6   :  { %v833_v58 = vsel %vm508_vm6, %v819_v57, %v832_v31  ;;  %1351 = vmatpush.bf16.msrb.mxu3 %v3297_v46 }
 0x1d7   :  { %v835_v12 = vmul.f32 %v833_v58, %v773_v55  ;;  %v1101_v55 = vld [vmem:[#allocation17 + $0x6] ss:$8 sm:$0x3] }
 0x1d8   :  { %1339 = vmatpush.bf16.msrb.mxu2 %v3225_v39  ;;  %v1103_v58 = vperm.slane %v1101_v55, 0 }
 0x1d9   :  { %v838_v60 = vperm.slane %v835_v12, 1  ;;  %v837_v61 = vperm.slane %v835_v12, 0  ;;  %1312 = vmatpush.bf16.msrb.mxu0 %v3229_v25  ;;  %v4033_v25 = vld [vmem:[#allocation8 + $0x174] sm:$0xf0] }
 0x1da   :  { %1352 = vmatpush.bf16.msrb.mxu3 %v3289_v53  ;;  %v3405_v28 = vor.u32 %v4033_v25, %v3404_v23  ;;  %v4042_v23 = vld [vmem:[#allocation8 + $0x1c4] sm:$0xf]  ;;  %v3446_v25 = vld [vmem:[#allocation8 + $0x1c8] sm:$0xf0] }
 0x1db   :  { %v842_v0 = vmul.f32 %v838_v60, %v4651_v29  ;;  %v841_v3 = vmul.f32 %v837_v61, %v4645_v2  ;;  %v4009_v29 = vld [vmem:[#allocation7 + $0x1b4] sm:$0xf0] }
 0x1dc   :  { %v3309_v2 = vor.u32 %v4009_v29, %v3308_v15 }
 0x1dd   :  { %v848_v51 = vadd.f32 %v844_v62, %v841_v3  ;;  %v849_v4 = vadd.f32 %v845_v63, %v842_v0  ;;  %1313 = vmatpush.bf16.msrb.mxu0 %v3221_v37  ;;  %v1104_v0 = vperm.slane %v1101_v55, 1  ;;  %v4048_v37 = vld [vmem:[#allocation8 + $0x1f4] sm:$0xf]  ;;  %v4046_v55 = vld [vmem:[#allocation8 + $0x1e4] sm:$0xf] }
 0x1de   :  { %1323 = vmatpush.bf16.msrb.mxu1 %v3309_v2  ;;  %v3473_v40 = vor.u32 %v4048_v37, %v3470_v38  ;;  %v3374_v37 = vld [vmem:[#allocation8 + $0x138] sm:$0xf0]  ;;  %v4040_v38 = vld [vmem:[#allocation8 + $0x1b4] sm:$0xf] }
 0x1df   :  { %v850_v5 = vmax.f32 %v848_v51, 0.0  ;;  %v851_v43 = vmax.f32 %v849_v4, 0.0 }
 0x1e1   :  { %v884_v6 = vpack.c.bf16 %v850_v5, %v850_v5  ;;  %v885_v7 = vpack.c.bf16 %v851_v43, %v851_v43 }
 0x1e2   :  { %1324 = vmatpush.bf16.msrb.mxu1 %v3301_v24  ;;  %v4049_v24 = vld [vmem:[#allocation8 + $0x1f4] sm:$0xf0] }
 0x1e3   :  { %1054 = vmatmul.bf16.vlgmr.msra.gmra.mxu0 %v884_v6  ;;  %1067 = vmatmul.bf16.vlgmr.msra.gmra.mxu1 %v885_v7  ;;  %v3469_v32 = vor.u32 %v4049_v24, %v3468_v26  ;;  %v3436_v24 = vld [vmem:[#allocation8 + $0x1b0] sm:$0xf] }
 0x1e4   :  { %1080 = vmatmul.bf16.vlgmr.msra.gmra.mxu2 %v884_v6  ;;  %1093 = vmatmul.bf16.vlgmr.msra.gmra.mxu3 %v885_v7 }
 0x1e5   :  { %1633 = vmatpush.bf16.msra.mxu0 %v3405_v28  ;;  %1659 = vmatpush.bf16.msra.mxu2 %v3409_v36  ;;  %v3372_v28 = vld [vmem:[#allocation8 + $0x130] sm:$0xf] }
 0x1e6   :  { %1325 = vmatpush.bf16.msrb.mxu1 %v3293_v44  ;;  %v3460_v44 = vld [vmem:[#allocation8 + $0x1e0] sm:$0xf]  ;;  %1672 = vmatpush.bf16.msra.mxu3 %v3473_v40 }
 0x1e7   :  { %v3461_v52 = vor.u32 %v4047_v48, %v3460_v44 }
 0x1e9   :  { %1634 = vmatpush.bf16.msra.mxu0 %v3397_v47  ;;  %v3428_v47 = vld [vmem:[#allocation8 + $0x1a0] sm:$0xf] }
 0x1ea   :  { %1326 = vmatpush.bf16.msrb.mxu1 %v3285_v50  ;;  %v3398_v50 = vld [vmem:[#allocation8 + $0x168] sm:$0xf0] }
 0x1eb   :  { %v3401_v53 = vor.u32 %v4030_v49, %v3398_v50 }
 0x1ed   :  { %1660 = vmatpush.bf16.msra.mxu2 %v3401_v53  ;;  %v4022_v53 = vld [vmem:[#allocation8 + $0x124] sm:$0xf] }
 0x1ee   :  { %1646 = vmatpush.bf16.msra.mxu1 %v3469_v32 }
 0x1f2   :  { %1647 = vmatpush.bf16.msra.mxu1 %v3461_v52  ;;  %v4039_v52 = vld [vmem:[#allocation8 + $0x1a4] sm:$0xf0] }
 0x260   :  { %v1055_v31 = vpop.f32.mrf.mxu0  ;;  %v1068_v56 = vpop.f32.mrf.mxu1 }
 0x261   :  { %v1069_v57 = vadd.f32 %v1068_v56, %v1055_v31  ;;  %v3462_v31 = vld [vmem:[#allocation8 + $0x1e8] sm:$0xf0] }
 0x263   :  { %v1098_v59 = vadd.f32 %v1069_v57, %v4632_v20 }
 0x265   :  { %v1107_v12 = vadd.f32 %v1103_v58, %v1098_v59  ;;  %v3465_v58 = vor.u32 %v4046_v55, %v3462_v31  ;;  %v3388_v59 = vld [vmem:[#allocation8 + $0x150] sm:$0xf]  ;;  %v3429_v55 = vor.u32 %v4039_v52, %v3428_v47  ;;  %v3366_v31 = vld [vmem:[#allocation8 + $0x128] sm:$0xf0]  ;;  %v4061_v47 = vld [vmem:[#allocation10 + $0x54] sm:$0xf0] }
 0x267   :  { %v4689_v60 = vmax.f32 %v1107_v12, 0.0  ;;  %v1081_v61 = vpop.f32.mrf.mxu2  ;;  %v1094_v62 = vpop.f32.mrf.mxu3  ;;  %v4029_v12 = vld [vmem:[#allocation8 + $0x154] sm:$0xf0]  ;;  %1673 = vmatpush.bf16.msra.mxu3 %v3465_v58  ;;  %v3430_v58 = vld [vmem:[#allocation8 + $0x1a8] sm:$0xf0] }
 0x268   :  { %v1095_v63 = vadd.f32 %v1094_v62, %v1081_v61  ;;  %v1057_v3 = vpop.f32.mrf.mxu0  ;;  %v1070_v51 = vpop.f32.mrf.mxu1  ;;  %v3452_v61 = vld [vmem:[#allocation8 + $0x1d0] sm:$0xf] }
 0x269   :  { %v1144_v4 = vpack.c.bf16 %v4689_v60, %v4689_v60  ;;  %v4045_v3 = vld [vmem:[#allocation8 + $0x1d4] sm:$0xf0]  ;;  %v4028_v51 = vld [vmem:[#allocation8 + $0x154] sm:$0xf] }
 0x26a   :  { %v1099_v5 = vadd.f32 %v1095_v63, %v4634_v21 }
 0x26b   :  { %1314 = vmatmul.bf16.vlgmr.msrb.gmra.mxu0 %v1144_v4  ;;  %1340 = vmatmul.bf16.vlgmr.msrb.gmra.mxu2 %v1144_v4  ;;  %v3390_v4 = vld [vmem:[#allocation8 + $0x158] sm:$0xf0] }
 0x26c   :  { %v1108_v43 = vadd.f32 %v1104_v0, %v1099_v5  ;;  %v3389_v0 = vor.u32 %v4029_v12, %v3388_v59  ;;  %v3453_v5 = vor.u32 %v4045_v3, %v3452_v61  ;;  %v3369_v61 = vor.u32 %v4022_v53, %v3366_v31  ;;  %v3420_v3 = vld [vmem:[#allocation8 + $0x190] sm:$0xf]  ;;  %v3534_v53 = vld [vmem:[#allocation10 + $0x78] sm:$0xf0] }
 0x26d   :  { %v3580_v31 = vld [vmem:[#allocation10 + $0xd0] sm:$0xf] }
 0x26e   :  { %v4694_v6 = vmax.f32 %v1108_v43, 0.0  ;;  %v3393_v43 = vor.u32 %v4028_v51, %v3390_v4  ;;  %1635 = vmatpush.bf16.msra.mxu0 %v3389_v0  ;;  %1648 = vmatpush.bf16.msra.mxu1 %v3453_v5  ;;  %v4021_v0 = vld [vmem:[#allocation8 + $0x114] sm:$0xf0] }
 0x26f   :  { %v1083_v20 = vpop.f32.mrf.mxu2  ;;  %v1096_v7 = vpop.f32.mrf.mxu3 }
 0x270   :  { %v1145_v8 = vpack.c.bf16 %v4694_v6, %v4694_v6  ;;  %v4044_v20 = vld [vmem:[#allocation8 + $0x1d4] sm:$0xf]  ;;  %v3454_v7 = vld [vmem:[#allocation8 + $0x1d8] sm:$0xf0]  ;;  %1661 = vmatpush.bf16.msra.mxu2 %v3393_v43  ;;  %v4037_v43 = vld [vmem:[#allocation8 + $0x194] sm:$0xf0] }
 0x272   :  { %1327 = vmatmul.bf16.vlgmr.msrb.gmra.mxu1 %v1145_v8  ;;  %1353 = vmatmul.bf16.vlgmr.msrb.gmra.mxu3 %v1145_v8 }
 0x2e8   :  { %v1315_v9 = vpop.f32.mrf.mxu0 }
 0x2ee   :  { %v1341_v10 = vpop.f32.mrf.mxu2 }
 0x2ef   :  { %v1328_v11 = vpop.f32.mrf.mxu1 }
 0x2f0   :  { %v1329_v13 = vadd.f32 %v1328_v11, %v1315_v9  ;;  %v1317_v14 = vpop.f32.mrf.mxu0  ;;  %v3380_v11 = vld [vmem:[#allocation8 + $0x140] sm:$0xf] }
 0x2f1   :  { %v3444_v14 = vld [vmem:[#allocation8 + $0x1c0] sm:$0xf] }
 0x2f2   :  { %v1362_v15 = vrot.slane %v1329_v13, 4 }
 0x2f4   :  { %v1363_v29 = vadd.f32 %v1362_v15, %v1329_v13 }
 0x2f5   :  { %v1354_v21 = vpop.f32.mrf.mxu3 }
 0x2f6   :  { %v1364_v16 = vrot.slane %v1363_v29, 2  ;;  %v4698_v2 = vadd.f32 %v1354_v21, %v1341_v10  ;;  %v1343_v17 = vpop.f32.mrf.mxu2  ;;  %v3457_v10 = vor.u32 %v4044_v20, %v3454_v7  ;;  %v3421_v20 = vor.u32 %v4037_v43, %v3420_v3  ;;  %v4020_v7 = vld [vmem:[#allocation8 + $0x114] sm:$0xf] }
 0x2f7   :  { %v1330_v18 = vpop.f32.mrf.mxu1  ;;  %v4026_v17 = vld [vmem:[#allocation8 + $0x144] sm:$0xf]  ;;  %v4080_v3 = vld [vmem:[#allocation10 + $0xf4] sm:$0xf] }
 0x2f8   :  { %v1365_v19 = vadd.f32 %v1364_v16, %v1363_v29  ;;  %v1368_v22 = vrot.slane %v4698_v2, 4  ;;  %v4043_v16 = vld [vmem:[#allocation8 + $0x1c4] sm:$0xf0]  ;;  %v3382_v18 = vld [vmem:[#allocation8 + $0x148] sm:$0xf0]  ;;  %1674 = vmatpush.bf16.msra.mxu3 %v3457_v10 }
 0x2fa   :  { %v1366_v27 = vrot.slane %v1365_v19, 1  ;;  %v1369_v54 = vadd.f32 %v1368_v22, %v4698_v2  ;;  %v3385_v22 = vor.u32 %v4026_v17, %v3382_v18  ;;  %v3412_v17 = vld [vmem:[#allocation8 + $0x180] sm:$0xf]  ;;  %v4035_v18 = vld [vmem:[#allocation8 + $0x184] sm:$0xf0] }
 0x2fc   :  { %v1367_v34 = vadd.f32 %v1366_v27, %v1365_v19  ;;  %v1370_v35 = vrot.slane %v1369_v54, 2  ;;  %v3445_v19 = vor.u32 %v4043_v16, %v3444_v14  ;;  %1662 = vmatpush.bf16.msra.mxu2 %v3385_v22  ;;  %v3348_v14 = vld [vmem:[#allocation8 + $0x100] sm:$0xf] }
 0x2fd   :  { %v1356_v39 = vpop.f32.mrf.mxu3 }
 0x2fe   :  { %v1374_v45 = vmul.f32 %v1367_v34, %v4613_v1  ;;  %v1371_v46 = vadd.f32 %v1370_v35, %v1369_v54  ;;  %v3449_v54 = vor.u32 %v4042_v23, %v3446_v25  ;;  %1649 = vmatpush.bf16.msra.mxu1 %v3445_v19  ;;  %v4041_v34 = vld [vmem:[#allocation8 + $0x1b4] sm:$0xf0]  ;;  %v4024_v35 = vld [vmem:[#allocation8 + $0x134] sm:$0xf]  ;;  %v3438_v39 = vld [vmem:[#allocation8 + $0x1b8] sm:$0xf0]  ;;  %v3413_v23 = vor.u32 %v4035_v18, %v3412_v17 }
 0x2ff   :  { %v3437_v36 = vor.u32 %v4041_v34, %v3436_v24  ;;  %v3377_v42 = vor.u32 %v4024_v35, %v3374_v37  ;;  %v3441_v44 = vor.u32 %v4040_v38, %v3438_v39  ;;  %v4018_v19 = vld [vmem:[#allocation8 + $0x104] sm:$0xf]  ;;  %v3350_v25 = vld [vmem:[#allocation8 + $0x108] sm:$0xf0]  ;;  %v4063_v37 = vld [vmem:[#allocation10 + $0x64] sm:$0xf0] }
 0x300   :  { %v4703_v56 = vsub.f32 %v1329_v13, %v1374_v45  ;;  %v1372_v57 = vrot.slane %v1371_v46, 1  ;;  %v4027_v13 = vld [vmem:[#allocation8 + $0x144] sm:$0xf0]  ;;  %1675 = vmatpush.bf16.msra.mxu3 %v3449_v54  ;;  %v3364_v45 = vld [vmem:[#allocation8 + $0x120] sm:$0xf]  ;;  %v3353_v54 = vor.u32 %v4018_v19, %v3350_v25 }
 0x301   :  { %v3381_v21 = vor.u32 %v4027_v13, %v3380_v11  ;;  %1663 = vmatpush.bf16.msra.mxu2 %v3377_v42  ;;  %v3422_v13 = vld [vmem:[#allocation8 + $0x198] sm:$0xf0]  ;;  %v3596_v38 = vld [vmem:[#allocation10 + $0xf0] sm:$0xf]  ;;  %v4081_v39 = vld [vmem:[#allocation10 + $0xf4] sm:$0xf0] }
 0x302   :  { %v1378_v62 = vmul.f32 %v4703_v56, %v4703_v56  ;;  %v1373_v63 = vadd.f32 %v1372_v57, %v1371_v46  ;;  %1650 = vmatpush.bf16.msra.mxu1 %v3437_v36  ;;  %v4023_v46 = vld [vmem:[#allocation8 + $0x124] sm:$0xf0]  ;;  %v4038_v57 = vld [vmem:[#allocation8 + $0x1a4] sm:$0xf]  ;;  %v3524_v36 = vld [vmem:[#allocation10 + $0x60] sm:$0xf] }
 0x303   :  { %1636 = vmatpush.bf16.msra.mxu0 %v3381_v21  ;;  %v3365_v50 = vor.u32 %v4023_v46, %v3364_v45  ;;  %v3588_v42 = vld [vmem:[#allocation10 + $0xe0] sm:$0xf]  ;;  %v3516_v46 = vld [vmem:[#allocation10 + $0x50] sm:$0xf]  ;;  %v4078_v17 = vld [vmem:[#allocation10 + $0xe4] sm:$0xf] }
 0x304   :  { %v1380_v8 = vrot.slane %v1378_v62, 4  ;;  %v1375_v9 = vmul.f32 %v1373_v63, %v4613_v1  ;;  %1676 = vmatpush.bf16.msra.mxu3 %v3441_v44  ;;  %v3356_v63 = vld [vmem:[#allocation8 + $0x110] sm:$0xf]  ;;  %v4079_v44 = vld [vmem:[#allocation10 + $0xe4] sm:$0xf0] }
 0x305   :  { %1664 = vmatpush.bf16.msra.mxu2 %v3369_v61  ;;  %v3357_v5 = vor.u32 %v4021_v0, %v3356_v63  ;;  %v3589_v52 = vor.u32 %v4079_v44, %v3588_v42  ;;  %v3526_v61 = vld [vmem:[#allocation10 + $0x68] sm:$0xf0]  ;;  %v4059_v63 = vld [vmem:[#allocation10 + $0x44] sm:$0xf0]  ;;  %v4056_v44 = vld [vmem:[#allocation10 + $0x34] sm:$0xf] }
 0x306   :  { %v1381_v15 = vadd.f32 %v1380_v8, %v1378_v62  ;;  %v4709_v29 = vsub.f32 %v4698_v2, %v1375_v9  ;;  %v4025_v2 = vld [vmem:[#allocation8 + $0x134] sm:$0xf0]  ;;  %v3433_v62 = vor.u32 %v4038_v57, %v3430_v58  ;;  %1651 = vmatpush.bf16.msra.mxu1 %v3429_v55  ;;  %v3358_v8 = vld [vmem:[#allocation8 + $0x118] sm:$0xf0]  ;;  %v4036_v9 = vld [vmem:[#allocation8 + $0x194] sm:$0xf] }
 0x307   :  { %v3373_v33 = vor.u32 %v4025_v2, %v3372_v28  ;;  %v3361_v11 = vor.u32 %v4020_v7, %v3358_v8  ;;  %v3425_v21 = vor.u32 %v4036_v9, %v3422_v13  ;;  %v4077_v57 = vld [vmem:[#allocation10 + $0xd4] sm:$0xf0]  ;;  %v3598_v7 = vld [vmem:[#allocation10 + $0xf8] sm:$0xf0]  ;;  %v4075_v8 = vld [vmem:[#allocation10 + $0xc4] sm:$0xf0] }
 0x308   :  { %v1382_v26 = vrot.slane %v1381_v15, 2  ;;  %v1379_v27 = vmul.f32 %v4709_v29, %v4709_v29  ;;  %1677 = vmatpush.bf16.msra.mxu3 %v3433_v62  ;;  %v3508_v62 = vld [vmem:[#allocation10 + $0x40] sm:$0xf]  ;;  %v3581_v43 = vor.u32 %v4077_v57, %v3580_v31  ;;  %v3601_v9 = vor.u32 %v4080_v3, %v3598_v7  ;;  %v3590_v18 = vld [vmem:[#allocation10 + $0xe8] sm:$0xf0] }
 0x309   :  { %1637 = vmatpush.bf16.msra.mxu0 %v3373_v33  ;;  %1665 = vmatpush.bf16.msra.mxu2 %v3361_v11  ;;  %v4065_v33 = vld [vmem:[#allocation10 + $0x74] sm:$0xf0]  ;;  %v3518_v11 = vld [vmem:[#allocation10 + $0x58] sm:$0xf0]  ;;  %v3484_v31 = vld [vmem:[#allocation10 + $0x10] sm:$0xf] }
 0x30a   :  { %v1383_v30 = vadd.f32 %v1382_v26, %v1381_v15  ;;  %v1386_v32 = vrot.slane %v1379_v27, 4  ;;  %v4019_v15 = vld [vmem:[#allocation8 + $0x104] sm:$0xf0]  ;;  %1652 = vmatpush.bf16.msra.mxu1 %v3421_v20  ;;  %v4034_v26 = vld [vmem:[#allocation8 + $0x184] sm:$0xf] }
 0x30b   :  { %v3349_v16 = vor.u32 %v4019_v15, %v3348_v14  ;;  %v3572_v20 = vld [vmem:[#allocation10 + $0xc0] sm:$0xf]  ;;  %v3509_v14 = vor.u32 %v4059_v63, %v3508_v62  ;;  %v3500_v15 = vld [vmem:[#allocation10 + $0x30] sm:$0xf]  ;;  %v4053_v57 = vld [vmem:[#allocation10 + $0x14] sm:$0xf0] }
 0x30c   :  { %v1384_v40 = vrot.slane %v1383_v30, 1  ;;  %v1387_v41 = vadd.f32 %v1386_v32, %v1379_v27  ;;  %v3414_v27 = vld [vmem:[#allocation8 + $0x188] sm:$0xf0]  ;;  %1678 = vmatpush.bf16.msra.mxu3 %v3425_v21  ;;  %v3532_v32 = vld [vmem:[#allocation10 + $0x70] sm:$0xf]  ;;  %v3573_v25 = vor.u32 %v4075_v8, %v3572_v20 }
 0x30d   :  { %1638 = vmatpush.bf16.msra.mxu0 %v3365_v50  ;;  %v3417_v28 = vor.u32 %v4034_v26, %v3414_v27  ;;  %1666 = vmatpush.bf16.msra.mxu2 %v3353_v54  ;;  %v3533_v35 = vor.u32 %v4065_v33, %v3532_v32  ;;  %v4057_v21 = vld [vmem:[#allocation10 + $0x34] sm:$0xf0]  ;;  %v3593_v26 = vor.u32 %v4078_v17, %v3590_v18  ;;  %v4058_v27 = vld [vmem:[#allocation10 + $0x44] sm:$0xf]  ;;  %v3510_v54 = vld [vmem:[#allocation10 + $0x48] sm:$0xf0] }
 0x30e   :  { %v1385_v48 = vadd.f32 %v1384_v40, %v1383_v30  ;;  %v1388_v49 = vrot.slane %v1387_v41, 2  ;;  %1653 = vmatpush.bf16.msra.mxu1 %v3413_v23  ;;  %v3525_v40 = vor.u32 %v4063_v37, %v3524_v36  ;;  %v4076_v32 = vld [vmem:[#allocation10 + $0xd4] sm:$0xf]  ;;  %v3582_v36 = vld [vmem:[#allocation10 + $0xd8] sm:$0xf0] }
 0x30f   :  { %v3548_v63 = vld [vmem:[#allocation10 + $0x90] sm:$0xf]  ;;  %v3476_v8 = vld [vmem:[#allocation10] sm:$0xf]  ;;  %v4072_v23 = vld [vmem:[#allocation10 + $0xb4] sm:$0xf] }
 0x310   :  { %v1392_v59 = vmul.f32 %v1385_v48, %v4613_v1  ;;  %v1389_v12 = vadd.f32 %v1388_v49, %v1387_v41  ;;  %1679 = vmatpush.bf16.msra.mxu3 %v3417_v28  ;;  %v3597_v41 = vor.u32 %v4081_v39, %v3596_v38  ;;  %v4064_v48 = vld [vmem:[#allocation10 + $0x74] sm:$0xf]  ;;  %v1359_v28 = vld [vmem:[#allocation17 + $0x3] ss:$8 sm:$0x3] }
 0x311   :  { %1639 = vmatpush.bf16.msra.mxu0 %v3357_v5  ;;  %v3537_v55 = vor.u32 %v4064_v48, %v3534_v53  ;;  %v3492_v38 = vld [vmem:[#allocation10 + $0x20] sm:$0xf]  ;;  %v4055_v39 = vld [vmem:[#allocation10 + $0x24] sm:$0xf0]  ;;  %v4088_v17 = vld [vmem:[#allocation11 + $0x30] sm:$0xff] }
 0x312   :  { %v4714_v51 = vadd.f32 1e-05, %v1392_v59  ;;  %v1390_v4 = vrot.slane %v1389_v12, 1  ;;  %1905 = vmatpush.bf16.msrb.mxu1 %v3597_v41  ;;  %v3517_v59 = vor.u32 %v4061_v47, %v3516_v46  ;;  %v3585_v41 = vor.u32 %v4076_v32, %v3582_v36  ;;  %v4074_v46 = vld [vmem:[#allocation10 + $0xc4] sm:$0xf] }
 0x313   :  { %1918 = vmatpush.bf16.msrb.mxu2 %v3537_v55  ;;  %v3556_v48 = vld [vmem:[#allocation10 + $0xa0] sm:$0xf]  ;;  %v3493_v53 = vor.u32 %v4055_v39, %v3492_v38  ;;  %v4070_v32 = vld [vmem:[#allocation10 + $0xa4] sm:$0xf] }
 0x314   :  { %4188 = vrsqrt.f32 %v4714_v51  ;;  %v1391_v10 = vadd.f32 %v1390_v4, %v1389_v12  ;;  %v4062_v12 = vld [vmem:[#allocation10 + $0x64] sm:$0xf]  ;;  %1931 = vmatpush.bf16.msrb.mxu3 %v3601_v9  ;;  %vm1402_vm2 = vweird.f32 %v4714_v51  ;;  %v4051_v9 = vld [vmem:[#allocation10 + $0x4] sm:$0xf0]  ;;  %v3540_v18 = vld [vmem:[#allocation10 + $0x80] sm:$0xf] }
 0x315   :  { %1640 = vmatpush.bf16.msra.mxu0 %v3349_v16  ;;  %v3529_v0 = vor.u32 %v4062_v12, %v3526_v61  ;;  %v4050_v36 = vld [vmem:[#allocation10 + $0x4] sm:$0xf] }
 0x316   :  { %v1393_v22 = vmul.f32 %v1391_v10, %v4613_v1  ;;  %1906 = vmatpush.bf16.msrb.mxu1 %v3589_v52  ;;  %v4060_v10 = vld [vmem:[#allocation10 + $0x54] sm:$0xf]  ;;  %v4086_v39 = vld [vmem:[#allocation11 + $0x20] sm:$0xff] }
 0x317   :  { %1919 = vmatpush.bf16.msrb.mxu2 %v3529_v0  ;;  %v3521_v16 = vor.u32 %v4060_v10, %v3518_v11  ;;  %v4069_v0 = vld [vmem:[#allocation10 + $0x94] sm:$0xf0] }
 0x318   :  { %v4718_v2 = vadd.f32 1e-05, %v1393_v22  ;;  %1932 = vmatpush.bf16.msrb.mxu3 %v3593_v26  ;;  %v3549_v7 = vor.u32 %v4069_v0, %v3548_v63 }
 0x319   :  { %1892 = vmatpush.bf16.msrb.mxu0 %v3533_v35  ;;  %v3501_v35 = vor.u32 %v4057_v21, %v3500_v15  ;;  %v3477_v15 = vor.u32 %v4051_v9, %v3476_v8  ;;  %v3494_v21 = vld [vmem:[#allocation10 + $0x28] sm:$0xf0] }
 0x31a   :  { %v4720_v24 = vpop.eup %4188  ;;  %4190 = vrsqrt.f32 %v4718_v2  ;;  %vm1412_vm0 = vweird.f32 %v4718_v2  ;;  %1907 = vmatpush.bf16.msrb.mxu1 %v3581_v43 }
 0x31b   :  { %v1397_v30 = vmul.f32 %v4720_v24, %v4714_v51  ;;  %vm1403_vm15 = vweird.f32 %v4720_v24  ;;  %1920 = vmatpush.bf16.msrb.mxu2 %v3521_v16 }
 0x31c   :  { %vm1404_vm3 = vmor %vm1402_vm2, %vm1403_vm15  ;;  %1933 = vmatpush.bf16.msrb.mxu3 %v3585_v41  ;;  %v3550_v41 = vld [vmem:[#allocation10 + $0x98] sm:$0xf0] }
 0x31d   :  { %v1398_v34 = vmul.f32 %v4720_v24, %v1397_v30  ;;  %1893 = vmatpush.bf16.msrb.mxu0 %v3525_v40  ;;  %v4073_v30 = vld [vmem:[#allocation10 + $0xb4] sm:$0xf0]  ;;  %v3513_v40 = vor.u32 %v4058_v27, %v3510_v54  ;;  %v4052_v54 = vld [vmem:[#allocation10 + $0x14] sm:$0xf] }
 0x31e   :  { %1908 = vmatpush.bf16.msrb.mxu1 %v3573_v25  ;;  %v3566_v25 = vld [vmem:[#allocation10 + $0xb8] sm:$0xf0] }
 0x31f   :  { %v1399_v49 = vmul.f32 0.5, %v1398_v34  ;;  %v1361_v34 = vld [vmem:[#allocation17 + $0x5] ss:$8 sm:$0x3]  ;;  %1921 = vmatpush.bf16.msrb.mxu2 %v3513_v40  ;;  %v3569_v26 = vor.u32 %v4072_v23, %v3566_v25  ;;  %v4097_v27 = vld [vmem:[#allocation11 + $0x78] sm:$0xff] }
 0x320   :  { %v4726_v45 = vpop.eup %4190  ;;  %v1430_v55 = vperm.slane %v1361_v34, 0  ;;  %v1431_v61 = vperm.slane %v1361_v34, 1  ;;  %v4068_v40 = vld [vmem:[#allocation10 + $0x94] sm:$0xf] }
 0x321   :  { %v1407_v50 = vmul.f32 %v4726_v45, %v4718_v2  ;;  %v1400_v4 = vsub.f32 1.5, %v1399_v49  ;;  %vm1413_vm14 = vweird.f32 %v4726_v45  ;;  %1894 = vmatpush.bf16.msrb.mxu0 %v3517_v59  ;;  %v3564_v2 = vld [vmem:[#allocation10 + $0xb0] sm:$0xf]  ;;  %v4071_v49 = vld [vmem:[#allocation10 + $0xa4] sm:$0xf0] }
 0x322   :  { %vm4738_vm1 = vmor %vm1412_vm0, %vm1413_vm14  ;;  %v3565_v42 = vor.u32 %v4073_v30, %v3564_v2  ;;  %v3557_v62 = vor.u32 %v4071_v49, %v3556_v48  ;;  %v4087_v30 = vld [vmem:[#allocation11 + $0x28] sm:$0xff]  ;;  %v4094_v48 = vld [vmem:[#allocation11 + $0x60] sm:$0xff] }
 0x323   :  { %v1408_v58 = vmul.f32 %v4726_v45, %v1407_v50  ;;  %v1401_v19 = vmul.f32 %v4720_v24, %v1400_v4  ;;  %v3574_v50 = vld [vmem:[#allocation10 + $0xc8] sm:$0xf0]  ;;  %v4084_v49 = vld [vmem:[#allocation11 + $0x10] sm:$0xff] }
 0x324   :  { %1909 = vmatpush.bf16.msrb.mxu1 %v3565_v42  ;;  %v4095_v42 = vld [vmem:[#allocation11 + $0x68] sm:$0xff] }
 0x325   :  { %v1409_v5 = vmul.f32 0.5, %v1408_v58  ;;  %1895 = vmatpush.bf16.msrb.mxu0 %v3509_v14  ;;  %v1405_v51 = vsel %vm1404_vm3, %v4720_v24, %v1401_v19  ;;  %v3577_v24 = vor.u32 %v4074_v46, %v3574_v50  ;;  %v4067_v19 = vld [vmem:[#allocation10 + $0x84] sm:$0xf0]  ;;  %v3542_v46 = vld [vmem:[#allocation10 + $0x88] sm:$0xf0]  ;;  %v4093_v50 = vld [vmem:[#allocation11 + $0x58] sm:$0xff] }
 0x327   :  { %v1410_v13 = vsub.f32 1.5, %v1409_v5  ;;  %v3485_v5 = vor.u32 %v4053_v57, %v3484_v31  ;;  %1934 = vmatpush.bf16.msrb.mxu3 %v3577_v24  ;;  %v4091_v31 = vld [vmem:[#allocation11 + $0x48] sm:$0xff]  ;;  %v4090_v57 = vld [vmem:[#allocation11 + $0x40] sm:$0xff] }
 0x328   :  { %1910 = vmatpush.bf16.msrb.mxu1 %v3557_v62 }
 0x329   :  { %v1411_v22 = vmul.f32 %v4726_v45, %v1410_v13  ;;  %1896 = vmatpush.bf16.msrb.mxu0 %v3501_v35  ;;  %v4096_v35 = vld [vmem:[#allocation11 + $0x70] sm:$0xff] }
 0x32b   :  { %v1415_v33 = vsel %vm4738_vm1, %v4726_v45, %v1411_v22  ;;  %v3502_v45 = vld [vmem:[#allocation10 + $0x38] sm:$0xf0]  ;;  %v3541_v22 = vor.u32 %v4067_v19, %v3540_v18  ;;  %1935 = vmatpush.bf16.msrb.mxu3 %v3569_v26 }
 0x32c   :  { %v1418_v37 = vrot.slane %v1415_v33, 7  ;;  %v3505_v58 = vor.u32 %v4056_v44, %v3502_v45  ;;  %1911 = vmatpush.bf16.msrb.mxu1 %v3549_v7  ;;  %v3558_v33 = vld [vmem:[#allocation10 + $0xa8] sm:$0xf0]  ;;  %v4085_v44 = vld [vmem:[#allocation11 + $0x18] sm:$0xff]  ;;  %v4066_v45 = vld [vmem:[#allocation10 + $0x84] sm:$0xf] }
 0x32d   :  { %1897 = vmatpush.bf16.msrb.mxu0 %v3493_v53  ;;  %v3561_v34 = vor.u32 %v4070_v32, %v3558_v33  ;;  %v4092_v53 = vld [vmem:[#allocation11 + $0x50] sm:$0xff]  ;;  %v4105_v32 = vld [vmem:[#allocation11 + $0xb8] sm:$0xff] }
 0x32e   :  { %v1419_v47 = vsel %vm508_vm6, %v1405_v51, %v1418_v37  ;;  %1922 = vmatpush.bf16.msrb.mxu2 %v3505_v58  ;;  %v3478_v37 = vld [vmem:[#allocation10 + $0x8] sm:$0xf0]  ;;  %v3553_v51 = vor.u32 %v4068_v40, %v3550_v41  ;;  %v4113_v33 = vld [vmem:[#allocation11 + $0xf8] sm:$0xff]  ;;  %v4104_v40 = vld [vmem:[#allocation11 + $0xb0] sm:$0xff] }
 0x32f   :  { %v1421_v52 = vmul.f32 %v1419_v47, %v1359_v28  ;;  %v3486_v28 = vld [vmem:[#allocation10 + $0x18] sm:$0xf0]  ;;  %1936 = vmatpush.bf16.msrb.mxu3 %v3561_v34  ;;  %v3481_v38 = vor.u32 %v4050_v36, %v3478_v37  ;;  %v3545_v47 = vor.u32 %v4066_v45, %v3542_v46  ;;  %v1688_v58 = vld [vmem:[#allocation17 + $0x7] ss:$8 sm:$0x3]  ;;  %v4112_v41 = vld [vmem:[#allocation11 + $0xf0] sm:$0xff] }
 0x330   :  { %1912 = vmatpush.bf16.msrb.mxu1 %v3541_v22  ;;  %v3489_v2 = vor.u32 %v4052_v54, %v3486_v28 }
 0x331   :  { %v1424_v59 = vperm.slane %v1421_v52, 1  ;;  %v1423_v12 = vperm.slane %v1421_v52, 0  ;;  %1898 = vmatpush.bf16.msrb.mxu0 %v3485_v5  ;;  %v4083_v52 = vld [vmem:[#allocation11 + $0x8] sm:$0xff] }
 0x333   :  { %v1428_v3 = vmul.f32 %v1424_v59, %v4709_v29  ;;  %v1427_v4 = vmul.f32 %v1423_v12, %v4703_v56  ;;  %v4089_v29 = vld [vmem:[#allocation11 + $0x38] sm:$0xff]  ;;  %v4054_v56 = vld [vmem:[#allocation10 + $0x24] sm:$0xf]  ;;  %1937 = vmatpush.bf16.msrb.mxu3 %v3553_v51 }
 0x334   :  { %v3497_v16 = vor.u32 %v4054_v56, %v3494_v21 }
 0x335   :  { %v1434_v43 = vadd.f32 %v1430_v55, %v1427_v4  ;;  %v1435_v20 = vadd.f32 %v1431_v61, %v1428_v3  ;;  %1899 = vmatpush.bf16.msrb.mxu0 %v3477_v15  ;;  %v4082_v55 = vld [vmem:[#allocation11] sm:$0xff]  ;;  %v1690_v61 = vperm.slane %v1688_v58, 0 }
 0x336   :  { %1923 = vmatpush.bf16.msrb.mxu2 %v3497_v16 }
 0x337   :  { %v1436_v10 = vmax.f32 %v1434_v43, 0.0  ;;  %v1437_v11 = vmax.f32 %v1435_v20, 0.0  ;;  %1938 = vmatpush.bf16.msrb.mxu3 %v3545_v47  ;;  %v1691_v43 = vperm.slane %v1688_v58, 1  ;;  %v4110_v58 = vld [vmem:[#allocation11 + $0xe0] sm:$0xff] }
 0x339   :  { %v1471_v13 = vpack.c.bf16 %v1436_v10, %v1436_v10  ;;  %v1472_v14 = vpack.c.bf16 %v1437_v11, %v1437_v11 }
 0x33a   :  { %1924 = vmatpush.bf16.msrb.mxu2 %v3489_v2 }
 0x33b   :  { %1641 = vmatmul.bf16.vlgmr.msra.gmra.mxu0 %v1471_v13  ;;  %1654 = vmatmul.bf16.vlgmr.msra.gmra.mxu1 %v1472_v14 }
 0x33c   :  { %1667 = vmatmul.bf16.vlgmr.msra.gmra.mxu2 %v1471_v13  ;;  %1680 = vmatmul.bf16.vlgmr.msra.gmra.mxu3 %v1472_v14 }
 0x33d   :  { %2284 = vmatpush.bf16.msra.mxu0 %v4089_v29  ;;  %2297 = vmatpush.bf16.msra.mxu1 %v4097_v27 }
 0x33e   :  { %1925 = vmatpush.bf16.msrb.mxu2 %v3481_v38  ;;  %2323 = vmatpush.bf16.msra.mxu3 %v4113_v33 }
 0x341   :  { %2285 = vmatpush.bf16.msra.mxu0 %v4088_v17  ;;  %2298 = vmatpush.bf16.msra.mxu1 %v4096_v35 }
 0x342   :  { %2310 = vmatpush.bf16.msra.mxu2 %v4105_v32  ;;  %2324 = vmatpush.bf16.msra.mxu3 %v4112_v41  ;;  %v1947_v41 = vld [vmem:[#allocation17 + $0x11] ss:$8 sm:$0x3] }
 0x345   :  { %2286 = vmatpush.bf16.msra.mxu0 %v4087_v30  ;;  %2299 = vmatpush.bf16.msra.mxu1 %v4095_v42  ;;  %v4172_v30 = vld [vmem:[%s4823_s10] ss:$0 sm:$0xff] }
 0x346   :  { %2311 = vmatpush.bf16.msra.mxu2 %v4104_v40 }
 0x349   :  { %2287 = vmatpush.bf16.msra.mxu0 %v4086_v39  ;;  %2300 = vmatpush.bf16.msra.mxu1 %v4094_v48 }
 0x34d   :  { %2288 = vmatpush.bf16.msra.mxu0 %v4085_v44  ;;  %2301 = vmatpush.bf16.msra.mxu1 %v4093_v50  ;;  %v4111_v50 = vld [vmem:[#allocation11 + $0xe8] sm:$0xff] }
 0x34e   :  { %2325 = vmatpush.bf16.msra.mxu3 %v4111_v50 }
 0x351   :  { %2289 = vmatpush.bf16.msra.mxu0 %v4084_v49  ;;  %2302 = vmatpush.bf16.msra.mxu1 %v4092_v53  ;;  %v4103_v49 = vld [vmem:[#allocation11 + $0xa8] sm:$0xff] }
 0x352   :  { %2312 = vmatpush.bf16.msra.mxu2 %v4103_v49  ;;  %2326 = vmatpush.bf16.msra.mxu3 %v4110_v58 }
 0x355   :  { %2290 = vmatpush.bf16.msra.mxu0 %v4083_v52  ;;  %2303 = vmatpush.bf16.msra.mxu1 %v4091_v31 }
 0x359   :  { %2291 = vmatpush.bf16.msra.mxu0 %v4082_v55  ;;  %2304 = vmatpush.bf16.msra.mxu1 %v4090_v57  ;;  %v4102_v57 = vld [vmem:[#allocation11 + $0xa0] sm:$0xff] }
 0x35a   :  { %2313 = vmatpush.bf16.msra.mxu2 %v4102_v57 }
 0x3b8   :  { %v1642_v24 = vpop.f32.mrf.mxu0  ;;  %v1655_v59 = vpop.f32.mrf.mxu1 }
 0x3b9   :  { %v1656_v12 = vadd.f32 %v1655_v59, %v1642_v24 }
 0x3bb   :  { %v1685_v62 = vadd.f32 %v1656_v12, %v4689_v60 }
 0x3bd   :  { %v1694_v63 = vadd.f32 %v1690_v61, %v1685_v62 }
 0x3bf   :  { %v1696_v0 = vmax.f32 %v1694_v63, 0.0  ;;  %v1668_v3 = vpop.f32.mrf.mxu2  ;;  %v1681_v4 = vpop.f32.mrf.mxu3  ;;  %v4101_v63 = vld [vmem:[#allocation11 + $0x98] sm:$0xff] }
 0x3c0   :  { %v1682_v5 = vadd.f32 %v1681_v4, %v1668_v3  ;;  %v1644_v20 = vpop.f32.mrf.mxu0  ;;  %v1657_v7 = vpop.f32.mrf.mxu1  ;;  %2314 = vmatpush.bf16.msra.mxu2 %v4101_v63 }
 0x3c1   :  { %v1730_v8 = vpack.c.bf16 %v1696_v0, %v1696_v0  ;;  %v4109_v0 = vld [vmem:[#allocation11 + $0xd8] sm:$0xff]  ;;  %v4100_v20 = vld [vmem:[#allocation11 + $0x90] sm:$0xff] }
 0x3c2   :  { %v1686_v9 = vadd.f32 %v1682_v5, %v4694_v6  ;;  %2327 = vmatpush.bf16.msra.mxu3 %v4109_v0  ;;  %v4108_v7 = vld [vmem:[#allocation11 + $0xd0] sm:$0xff] }
 0x3c3   :  { %1900 = vmatmul.bf16.vlgmr.msrb.gmra.mxu0 %v1730_v8  ;;  %1926 = vmatmul.bf16.vlgmr.msrb.gmra.mxu2 %v1730_v8 }
 0x3c4   :  { %v1695_v10 = vadd.f32 %v1691_v43, %v1686_v9  ;;  %2315 = vmatpush.bf16.msra.mxu2 %v4100_v20 }
 0x3c6   :  { %v1697_v11 = vmax.f32 %v1695_v10, 0.0  ;;  %2328 = vmatpush.bf16.msra.mxu3 %v4108_v7 }
 0x3c7   :  { %v1670_v13 = vpop.f32.mrf.mxu2  ;;  %v1683_v14 = vpop.f32.mrf.mxu3 }
 0x3c8   :  { %v1731_v15 = vpack.c.bf16 %v1697_v11, %v1697_v11  ;;  %v4099_v13 = vld [vmem:[#allocation11 + $0x88] sm:$0xff] }
 0x3c9   :  { %v4107_v14 = vld [vmem:[#allocation11 + $0xc8] sm:$0xff]  ;;  %2316 = vmatpush.bf16.msra.mxu2 %v4099_v13 }
 0x3ca   :  { %1913 = vmatmul.bf16.vlgmr.msrb.gmra.mxu1 %v1731_v15  ;;  %1939 = vmatmul.bf16.vlgmr.msrb.gmra.mxu3 %v1731_v15 }
 0x3cb   :  { %2329 = vmatpush.bf16.msra.mxu3 %v4107_v14 }
 0x3d3   :  { %2292 = vmatmul.bf16.vlgmr.msra.gmra.mxu0 %v1730_v8 }
 0x3da   :  { %2305 = vmatmul.bf16.vlgmr.msra.gmra.mxu1 %v1731_v15 }
 0x440   :  { %v1901_v60 = vpop.f32.mrf.mxu0 }
 0x446   :  { %v1927_v29 = vpop.f32.mrf.mxu2 }
 0x447   :  { %v1914_v56 = vpop.f32.mrf.mxu1 }
 0x448   :  { %v1915_v21 = vadd.f32 %v1914_v56, %v1901_v60  ;;  %v1903_v16 = vpop.f32.mrf.mxu0  ;;  %v4098_v60 = vld [vmem:[#allocation11 + $0x80] sm:$0xff] }
 0x449   :  { %2317 = vmatpush.bf16.msra.mxu2 %v4098_v60 }
 0x44a   :  { %v1948_v17 = vrot.slane %v1915_v21, 4 }
 0x44c   :  { %v1949_v18 = vadd.f32 %v1948_v17, %v1915_v21 }
 0x44d   :  { %v1940_v19 = vpop.f32.mrf.mxu3 }
 0x44e   :  { %v1950_v6 = vrot.slane %v1949_v18, 2  ;;  %v1941_v22 = vadd.f32 %v1940_v19, %v1927_v29  ;;  %v1929_v23 = vpop.f32.mrf.mxu2  ;;  %v4106_v29 = vld [vmem:[#allocation11 + $0xc0] sm:$0xff] }
 0x44f   :  { %v1916_v25 = vpop.f32.mrf.mxu1  ;;  %2330 = vmatpush.bf16.msra.mxu3 %v4106_v29 }
 0x450   :  { %v1951_v26 = vadd.f32 %v1950_v6, %v1949_v18  ;;  %v1954_v27 = vrot.slane %v1941_v22, 4  ;;  %v2293_v54 = vpop.f32.mrf.mxu0  ;;  %v4121_v18 = vld [vmem:[#allocation13 + $0x38] sm:$0xff]  ;;  %v4120_v6 = vld [vmem:[#allocation13 + $0x30] sm:$0xff] }
 0x451   :  { %v2294_v39 = vadd.f32 %v4172_v30, %v2293_v54  ;;  %2402 = vmatpush.bf16.msrb.mxu0 %v4121_v18 }
 0x452   :  { %v1952_v28 = vrot.slane %v1951_v26, 1  ;;  %v1955_v2 = vadd.f32 %v1954_v27, %v1941_v22 }
 0x454   :  { %v1953_v34 = vadd.f32 %v1952_v28, %v1951_v26  ;;  %v1956_v35 = vrot.slane %v1955_v2, 2  ;;  %v4119_v26 = vld [vmem:[#allocation13 + $0x28] sm:$0xff] }
 0x455   :  { %v1942_v36 = vpop.f32.mrf.mxu3  ;;  %2403 = vmatpush.bf16.msrb.mxu0 %v4120_v6  ;;  %v4123_v6 = vld [vmem:[#allocation14 + $0x8] sm:$0xff] }
 0x456   :  { %v1960_v37 = vmul.f32 %v1953_v34, %v4613_v1  ;;  %v1957_v38 = vadd.f32 %v1956_v35, %v1955_v2  ;;  %v4118_v2 = vld [vmem:[#allocation13 + $0x20] sm:$0xff]  ;;  %v4117_v34 = vld [vmem:[#allocation13 + $0x18] sm:$0xff] }
 0x457   :  { %v2306_v51 = vpop.f32.mrf.mxu1  ;;  %v1945_v36 = vld [vmem:[#allocation17 + $0x10] ss:$8 sm:$0x3] }
 0x458   :  { %v4758_v42 = vsub.f32 %v1915_v21, %v1960_v37  ;;  %v1958_v44 = vrot.slane %v1957_v38, 1  ;;  %v4760_v45 = vadd.f32 %v2306_v51, %v2294_v39  ;;  %v2295_v46 = vpop.f32.mrf.mxu0  ;;  %v4116_v39 = vld [vmem:[#allocation13 + $0x10] sm:$0xff] }
 0x459   :  { %2404 = vmatpush.bf16.msrb.mxu0 %v4119_v26 }
 0x45a   :  { %v1964_v47 = vmul.f32 %v4758_v42, %v4758_v42  ;;  %v1959_v48 = vadd.f32 %v1958_v44, %v1957_v38 }
 0x45c   :  { %v1966_v52 = vrot.slane %v1964_v47, 4  ;;  %v1961_v53 = vmul.f32 %v1959_v48, %v4613_v1  ;;  %v2017_v48 = vperm.slane %v1947_v41, 1 }
 0x45d   :  { %2405 = vmatpush.bf16.msrb.mxu0 %v4118_v2  ;;  %v4136_v2 = vld [vmem:[#allocation13 + $0x70] sm:$0xff] }
 0x45e   :  { %v1967_v55 = vadd.f32 %v1966_v52, %v1964_v47  ;;  %v4765_v31 = vsub.f32 %v1941_v22, %v1961_v53  ;;  %v2016_v47 = vperm.slane %v1947_v41, 0  ;;  %v4132_v41 = vld [vmem:[#allocation13 + $0x50] sm:$0xff] }
 0x45f   :  { %v2308_v24 = vpop.f32.mrf.mxu1 }
 0x460   :  { %v1968_v59 = vrot.slane %v1967_v55, 2  ;;  %v1965_v12 = vmul.f32 %v4765_v31, %v4765_v31 }
 0x461   :  { %2406 = vmatpush.bf16.msrb.mxu0 %v4117_v34  ;;  %v4134_v34 = vld [vmem:[#allocation13 + $0x60] sm:$0xff] }
 0x462   :  { %v1969_v61 = vadd.f32 %v1968_v59, %v1967_v55  ;;  %v1972_v62 = vrot.slane %v1965_v12, 4  ;;  %v4115_v59 = vld [vmem:[#allocation13 + $0x8] sm:$0xff] }
 0x464   :  { %v1970_v3 = vrot.slane %v1969_v61, 1  ;;  %v1973_v4 = vadd.f32 %v1972_v62, %v1965_v12  ;;  %v4114_v12 = vld [vmem:[#allocation13] sm:$0xff] }
 0x465   :  { %2407 = vmatpush.bf16.msrb.mxu0 %v4116_v39  ;;  %v2415_v39 = vld [vmem:[%s4823_s10 + $0x1] sm:$0x1] }
 0x466   :  { %v1971_v5 = vadd.f32 %v1970_v3, %v1969_v61  ;;  %v1974_v43 = vrot.slane %v1973_v4, 2 }
 0x468   :  { %v1978_v8 = vmul.f32 %v1971_v5, %v4613_v1  ;;  %v1975_v9 = vadd.f32 %v1974_v43, %v1973_v4  ;;  %v4129_v43 = vld [vmem:[#allocation14 + $0x38] sm:$0xff] }
 0x469   :  { %2408 = vmatpush.bf16.msrb.mxu0 %v4115_v59  ;;  %2515 = vmatpush.bf16.msrb.mxu1 %v4129_v43 }
 0x46a   :  { %v1980_v10 = vadd.f32 1e-05, %v1978_v8  ;;  %v1976_v11 = vrot.slane %v1975_v9, 1  ;;  %v4128_v8 = vld [vmem:[#allocation14 + $0x30] sm:$0xff] }
 0x46c   :  { %4192 = vrsqrt.f32 %v1980_v10  ;;  %v1977_v15 = vadd.f32 %v1976_v11, %v1975_v9  ;;  %vm1988_vm9 = vweird.f32 %v1980_v10 }
 0x46d   :  { %2409 = vmatpush.bf16.msrb.mxu0 %v4114_v12  ;;  %2516 = vmatpush.bf16.msrb.mxu1 %v4128_v8 }
 0x46e   :  { %v1979_v56 = vmul.f32 %v1977_v15, %v4613_v1  ;;  %v4126_v15 = vld [vmem:[#allocation14 + $0x20] sm:$0xff] }
 0x470   :  { %v1981_v21 = vadd.f32 1e-05, %v1979_v56  ;;  %v4125_v56 = vld [vmem:[#allocation14 + $0x18] sm:$0xff] }
 0x472   :  { %v4193_v16 = vpop.eup %4192  ;;  %4194 = vrsqrt.f32 %v1981_v21  ;;  %vm1998_vm7 = vweird.f32 %v1981_v21 }
 0x473   :  { %v1983_v17 = vmul.f32 %v4193_v16, %v1980_v10  ;;  %vm1989_vm5 = vweird.f32 %v4193_v16 }
 0x474   :  { %vm1990_vm10 = vmor %vm1988_vm9, %vm1989_vm5 }
 0x475   :  { %v1984_v19 = vmul.f32 %v4193_v16, %v1983_v17  ;;  %v4124_v17 = vld [vmem:[#allocation14 + $0x10] sm:$0xff] }
 0x477   :  { %v1985_v23 = vmul.f32 0.5, %v1984_v19 }
 0x478   :  { %v4195_v22 = vpop.eup %4194 }
 0x479   :  { %v1993_v25 = vmul.f32 %v4195_v22, %v1981_v21  ;;  %v1986_v54 = vsub.f32 1.5, %v1985_v23  ;;  %vm1999_vm4 = vweird.f32 %v4195_v22 }
 0x47a   :  { %vm2000_vm8 = vmor %vm1998_vm7, %vm1999_vm4 }
 0x47b   :  { %v1994_v27 = vmul.f32 %v4195_v22, %v1993_v25  ;;  %v1987_v32 = vmul.f32 %v4193_v16, %v1986_v54  ;;  %v4122_v25 = vld [vmem:[#allocation14] sm:$0xff] }
 0x47d   :  { %v1995_v28 = vmul.f32 0.5, %v1994_v27  ;;  %v1991_v38 = vsel %vm1990_vm10, %v4193_v16, %v1987_v32 }
 0x47f   :  { %v1996_v30 = vsub.f32 1.5, %v1995_v28  ;;  %v4137_v28 = vld [vmem:[#allocation13 + $0x78] sm:$0xff] }
 0x480   :  { %2599 = vmatpush.bf16.msrb.mxu2 %v4137_v28 }
 0x481   :  { %v1997_v33 = vmul.f32 %v4195_v22, %v1996_v30  ;;  %v4135_v30 = vld [vmem:[#allocation13 + $0x68] sm:$0xff] }
 0x483   :  { %v2001_v35 = vsel %vm2000_vm8, %v4195_v22, %v1997_v33 }
 0x484   :  { %v2004_v37 = vrot.slane %v2001_v35, 7  ;;  %2600 = vmatpush.bf16.msrb.mxu2 %v4136_v2 }
 0x486   :  { %v2005_v40 = vsel %vm508_vm6, %v1991_v38, %v2004_v37  ;;  %v4133_v37 = vld [vmem:[#allocation13 + $0x58] sm:$0xff] }
 0x487   :  { %v2007_v51 = vmul.f32 %v2005_v40, %v1945_v36 }
 0x488   :  { %2601 = vmatpush.bf16.msrb.mxu2 %v4135_v30  ;;  %v4149_v30 = vld [vmem:[#allocation16 + $0x18] sm:$0xff] }
 0x489   :  { %v2010_v44 = vperm.slane %v2007_v51, 1  ;;  %v2009_v46 = vperm.slane %v2007_v51, 0 }
 0x48b   :  { %v2014_v49 = vmul.f32 %v2010_v44, %v4765_v31  ;;  %v2013_v50 = vmul.f32 %v2009_v46, %v4758_v42 }
 0x48c   :  { %2602 = vmatpush.bf16.msrb.mxu2 %v4134_v34  ;;  %v4148_v34 = vld [vmem:[#allocation16 + $0x10] sm:$0xff] }
 0x48d   :  { %v2020_v52 = vadd.f32 %v2016_v47, %v2013_v50  ;;  %v2021_v53 = vadd.f32 %v2017_v48, %v2014_v49  ;;  %v4173_v47 = vld [vmem:[%s4823_s10 + $0x3] ss:$0 sm:$0xff] }
 0x48f   :  { %v2022_v55 = vmax.f32 %v2020_v52, 0.0  ;;  %v2023_v57 = vmax.f32 %v2021_v53, 0.0  ;;  %v4131_v53 = vld [vmem:[#allocation13 + $0x48] sm:$0xff] }
 0x490   :  { %2603 = vmatpush.bf16.msrb.mxu2 %v4133_v37 }
 0x491   :  { %v2088_v58 = vpack.c.bf16 %v2022_v55, %v2022_v55  ;;  %v2089_v24 = vpack.c.bf16 %v2023_v57, %v2023_v57  ;;  %v4130_v55 = vld [vmem:[#allocation13 + $0x40] sm:$0xff]  ;;  %v4174_v57 = vld [vmem:[%s4823_s10 + $0x5] ss:$0 sm:$0xff] }
 0x493   :  { %2318 = vmatmul.bf16.vlgmr.msra.gmra.mxu2 %v2088_v58  ;;  %2331 = vmatmul.bf16.vlgmr.msra.gmra.mxu3 %v2089_v24 }
 0x494   :  { %2604 = vmatpush.bf16.msrb.mxu2 %v4132_v41 }
 0x498   :  { %2605 = vmatpush.bf16.msrb.mxu2 %v4131_v53 }
 0x49c   :  { %2606 = vmatpush.bf16.msrb.mxu2 %v4130_v55 }
 0x516   :  { %v2319_v61 = vpop.f32.mrf.mxu2  ;;  %v2332_v62 = vpop.f32.mrf.mxu3 }
 0x517   :  { %v2320_v63 = vadd.f32 %v2319_v61, %v4760_v45  ;;  %v4127_v45 = vld [vmem:[#allocation14 + $0x28] sm:$0xff] }
 0x518   :  { %2517 = vmatpush.bf16.msrb.mxu1 %v4127_v45  ;;  %v4141_v45 = vld [vmem:[#allocation14 + $0x58] sm:$0xff] }
 0x519   :  { %v2333_v0 = vadd.f32 %v2332_v62, %v2320_v63 }
 0x51b   :  { %v4775_v31 = vmax.f32 %v2333_v0, 0.0  ;;  %v4145_v0 = vld [vmem:[#allocation14 + $0x78] sm:$0xff] }
 0x51c   :  { %2518 = vmatpush.bf16.msrb.mxu1 %v4126_v15  ;;  %2713 = vmatpush.bf16.msrb.mxu3 %v4145_v0  ;;  %v4140_v15 = vld [vmem:[#allocation14 + $0x50] sm:$0xff] }
 0x51d   :  { %v2353_v42 = vpack.c.bf16 %v4775_v31, %v4775_v31 }
 0x51e   :  { %v2321_v3 = vpop.f32.mrf.mxu2  ;;  %v2334_v4 = vpop.f32.mrf.mxu3 }
 0x51f   :  { %2410 = vmatmul.bf16.vlgmr.msrb.gmra.mxu0 %v2353_v42  ;;  %v4144_v4 = vld [vmem:[#allocation14 + $0x70] sm:$0xff] }
 0x520   :  { %2519 = vmatpush.bf16.msrb.mxu1 %v4125_v56  ;;  %2714 = vmatpush.bf16.msrb.mxu3 %v4144_v4  ;;  %v4139_v56 = vld [vmem:[#allocation14 + $0x48] sm:$0xff] }
 0x524   :  { %2520 = vmatpush.bf16.msrb.mxu1 %v4124_v17  ;;  %v4138_v17 = vld [vmem:[#allocation14 + $0x40] sm:$0xff] }
 0x528   :  { %2521 = vmatpush.bf16.msrb.mxu1 %v4123_v6 }
 0x52c   :  { %2522 = vmatpush.bf16.msrb.mxu1 %v4122_v25  ;;  %v4151_v25 = vld [vmem:[#allocation16 + $0x28] sm:$0xff] }
 0x59c   :  { %v2411_v5 = vpop.f32.mrf.mxu0 }
 0x59d   :  { %v2417_v20 = vrot.slane %v2411_v5, 4 }
 0x59f   :  { %v2418_v7 = vadd.f32 %v2417_v20, %v2411_v5 }
 0x5a1   :  { %v2419_v9 = vrot.slane %v2418_v7, 2 }
 0x5a3   :  { %v2420_v10 = vadd.f32 %v2419_v9, %v2418_v7  ;;  %v4143_v7 = vld [vmem:[#allocation14 + $0x68] sm:$0xff]  ;;  %v4142_v9 = vld [vmem:[#allocation14 + $0x60] sm:$0xff] }
 0x5a4   :  { %v2413_v11 = vpop.f32.mrf.mxu0  ;;  %2715 = vmatpush.bf16.msrb.mxu3 %v4143_v7 }
 0x5a5   :  { %v2421_v13 = vrot.slane %v2420_v10, 1 }
 0x5a7   :  { %v2422_v14 = vadd.f32 %v2421_v13, %v2420_v10 }
 0x5a8   :  { %2716 = vmatpush.bf16.msrb.mxu3 %v4142_v9 }
 0x5a9   :  { %v2423_v60 = vmul.f32 %v2422_v14, %v4613_v1 }
 0x5ab   :  { %v2424_v29 = vsub.f32 %v2411_v5, %v2423_v60 }
 0x5ac   :  { %2717 = vmatpush.bf16.msrb.mxu3 %v4141_v45 }
 0x5ad   :  { %v2425_v21 = vmul.f32 %v2424_v29, %v2424_v29 }
 0x5af   :  { %v2426_v16 = vrot.slane %v2425_v21, 4 }
 0x5b0   :  { %2718 = vmatpush.bf16.msrb.mxu3 %v4140_v15 }
 0x5b1   :  { %v2427_v18 = vadd.f32 %v2426_v16, %v2425_v21 }
 0x5b3   :  { %v2428_v19 = vrot.slane %v2427_v18, 2 }
 0x5b4   :  { %2719 = vmatpush.bf16.msrb.mxu3 %v4139_v56 }
 0x5b5   :  { %v2429_v22 = vadd.f32 %v2428_v19, %v2427_v18 }
 0x5b7   :  { %v2430_v23 = vrot.slane %v2429_v22, 1 }
 0x5b8   :  { %2720 = vmatpush.bf16.msrb.mxu3 %v4138_v17 }
 0x5b9   :  { %v2431_v26 = vadd.f32 %v2430_v23, %v2429_v22  ;;  %v4153_v22 = vld [vmem:[#allocation16 + $0x38] sm:$0xff]  ;;  %v4152_v23 = vld [vmem:[#allocation16 + $0x30] sm:$0xff] }
 0x5ba   :  { %2798 = vmatpush.bf16.msra.mxu0 %v4153_v22 }
 0x5bb   :  { %v2432_v27 = vmul.f32 %v2431_v26, %v4613_v1 }
 0x5bd   :  { %v2433_v54 = vadd.f32 1e-05, %v2432_v27 }
 0x5be   :  { %2799 = vmatpush.bf16.msra.mxu0 %v4152_v23 }
 0x5bf   :  { %4196 = vrsqrt.f32 %v2433_v54  ;;  %vm2440_vm11 = vweird.f32 %v2433_v54 }
 0x5c2   :  { %2800 = vmatpush.bf16.msra.mxu0 %v4151_v25 }
 0x5c5   :  { %v4197_v32 = vpop.eup %4196 }
 0x5c6   :  { %v2435_v33 = vmul.f32 %v4197_v32, %v2433_v54  ;;  %vm2441_vm6 = vweird.f32 %v4197_v32  ;;  %v4150_v54 = vld [vmem:[#allocation16 + $0x20] sm:$0xff] }
 0x5c7   :  { %vm2442_vm12 = vmor %vm2440_vm11, %vm2441_vm6  ;;  %2801 = vmatpush.bf16.msra.mxu0 %v4150_v54 }
 0x5c8   :  { %v2436_v35 = vmul.f32 %v4197_v32, %v2435_v33 }
 0x5ca   :  { %v2437_v36 = vmul.f32 0.5, %v2436_v35 }
 0x5cb   :  { %2802 = vmatpush.bf16.msra.mxu0 %v4149_v30 }
 0x5cc   :  { %v2438_v38 = vsub.f32 1.5, %v2437_v36 }
 0x5ce   :  { %v2439_v40 = vmul.f32 %v4197_v32, %v2438_v38  ;;  %v4175_v38 = vld [vmem:[%s4823_s10 + $0x4] ss:$0 sm:$0xff] }
 0x5cf   :  { %2803 = vmatpush.bf16.msra.mxu0 %v4148_v34 }
 0x5d0   :  { %v2443_v51 = vsel %vm2442_vm12, %v4197_v32, %v2439_v40 }
 0x5d1   :  { %v2444_v44 = vmul.f32 %v2443_v51, %v2415_v39 }
 0x5d3   :  { %v2445_v46 = vperm.slane %v2444_v44, 0  ;;  %v4147_v44 = vld [vmem:[#allocation16 + $0x8] sm:$0xff] }
 0x5d4   :  { %2804 = vmatpush.bf16.msra.mxu0 %v4147_v44 }
 0x5d5   :  { %v2446_v48 = vmul.f32 %v2445_v46, %v2424_v29  ;;  %v4146_v46 = vld [vmem:[#allocation16] sm:$0xff] }
 0x5d7   :  { %v2448_v49 = vadd.f32 %v4173_v47, %v2446_v48  ;;  %v4176_v47 = vld [vmem:[%s4823_s10 + $0x6] ss:$0 sm:$0xff] }
 0x5d8   :  { %2805 = vmatpush.bf16.msra.mxu0 %v4146_v46 }
 0x5d9   :  { %v2449_v50 = vmax.f32 %v2448_v49, 0.0 }
 0x5db   :  { %v2466_v52 = vpack.c.bf16 %v2449_v50, %v2449_v50 }
 0x5dd   :  { %2523 = vmatmul.bf16.vlgmr.msrb.gmra.mxu1 %v2466_v52 }
 0x65a   :  { %v2524_v58 = vpop.f32.mrf.mxu1 }
 0x65b   :  { %v2528_v24 = vadd.f32 %v2524_v58, %v4775_v31 }
 0x65d   :  { %v2531_v59 = vadd.f32 %v4174_v57, %v2528_v24  ;;  %v4177_v57 = vld [vmem:[%s4823_s10 + $0x7] ss:$0 sm:$0xff] }
 0x65f   :  { %v4791_v12 = vmax.f32 %v2531_v59, 0.0 }
 0x661   :  { %v2550_v61 = vpack.c.bf16 %v4791_v12, %v4791_v12 }
 0x662   :  { %v2526_v62 = vpop.f32.mrf.mxu1 }
 0x663   :  { %2607 = vmatmul.bf16.vlgmr.msrb.gmra.mxu2 %v2550_v61 }
 0x6e6   :  { %v2608_v63 = vpop.f32.mrf.mxu2 }
 0x6e7   :  { %v2614_v42 = vrot.slane %v2608_v63, 4 }
 0x6e9   :  { %v2615_v3 = vadd.f32 %v2614_v42, %v2608_v63 }
 0x6eb   :  { %v2616_v5 = vrot.slane %v2615_v3, 2 }
 0x6ed   :  { %v2617_v43 = vadd.f32 %v2616_v5, %v2615_v3 }
 0x6ee   :  { %v2610_v20 = vpop.f32.mrf.mxu2 }
 0x6ef   :  { %v2618_v31 = vrot.slane %v2617_v43, 1 }
 0x6f1   :  { %v2619_v8 = vadd.f32 %v2618_v31, %v2617_v43 }
 0x6f3   :  { %v2620_v10 = vmul.f32 %v2619_v8, %v4613_v1 }
 0x6f5   :  { %v2621_v11 = vsub.f32 %v2608_v63, %v2620_v10 }
 0x6f7   :  { %v2622_v13 = vmul.f32 %v2621_v11, %v2621_v11 }
 0x6f9   :  { %v2623_v14 = vrot.slane %v2622_v13, 4 }
 0x6fb   :  { %v2624_v60 = vadd.f32 %v2623_v14, %v2622_v13 }
 0x6fd   :  { %v2625_v29 = vrot.slane %v2624_v60, 2 }
 0x6ff   :  { %v2626_v21 = vadd.f32 %v2625_v29, %v2624_v60 }
 0x701   :  { %v2627_v16 = vrot.slane %v2626_v21, 1 }
 0x703   :  { %v2628_v18 = vadd.f32 %v2627_v16, %v2626_v21 }
 0x705   :  { %v2629_v19 = vmul.f32 %v2628_v18, %v4613_v1  ;;  %v2612_v1 = vld [vmem:[%s4823_s10 + $0x2] sm:$0x1] }
 0x707   :  { %v2630_v6 = vadd.f32 1e-05, %v2629_v19 }
 0x709   :  { %4198 = vrsqrt.f32 %v2630_v6  ;;  %vm2637_vm14 = vweird.f32 %v2630_v6 }
 0x70f   :  { %v4199_v26 = vpop.eup %4198 }
 0x710   :  { %v2632_v27 = vmul.f32 %v4199_v26, %v2630_v6  ;;  %vm2638_vm13 = vweird.f32 %v4199_v26 }
 0x711   :  { %vm2639_vm15 = vmor %vm2637_vm14, %vm2638_vm13 }
 0x712   :  { %v2633_v28 = vmul.f32 %v4199_v26, %v2632_v27 }
 0x714   :  { %v2634_v2 = vmul.f32 0.5, %v2633_v28 }
 0x716   :  { %v2635_v32 = vsub.f32 1.5, %v2634_v2 }
 0x718   :  { %v2636_v33 = vmul.f32 %v4199_v26, %v2635_v32 }
 0x71a   :  { %v2640_v35 = vsel %vm2639_vm15, %v4199_v26, %v2636_v33 }
 0x71b   :  { %v2641_v36 = vmul.f32 %v2640_v35, %v2612_v1 }
 0x71d   :  { %v2642_v37 = vperm.slane %v2641_v36, 0 }
 0x71f   :  { %v2643_v39 = vmul.f32 %v2642_v37, %v2621_v11 }
 0x721   :  { %v2645_v40 = vadd.f32 %v4175_v38, %v2643_v39 }
 0x723   :  { %v2646_v41 = vmax.f32 %v2645_v40, 0.0 }
 0x725   :  { %v2664_v51 = vpack.c.bf16 %v2646_v41, %v2646_v41 }
 0x727   :  { %2721 = vmatmul.bf16.vlgmr.msrb.gmra.mxu3 %v2664_v51 }
 0x7aa   :  { %v2722_v48 = vpop.f32.mrf.mxu3 }
 0x7ab   :  { %v2726_v49 = vadd.f32 %v2722_v48, %v4791_v12 }
 0x7ad   :  { %v2729_v50 = vadd.f32 %v4176_v47, %v2726_v49 }
 0x7af   :  { %v2730_v52 = vmax.f32 %v2729_v50, 0.0 }
 0x7b1   :  { %v2747_v53 = vpack.c.bf16 %v2730_v52, %v2730_v52 }
 0x7b2   :  { %v2724_v55 = vpop.f32.mrf.mxu3 }
 0x7b3   :  { %2806 = vmatmul.bf16.vlgmr.msra.gmra.mxu0 %v2747_v53 }
 0x830   :  { %v2807_v58 = vpop.f32.mrf.mxu0 }
 0x831   :  { %v2808_v24 = vadd.f32 %v4177_v57, %v2807_v58 }
 0x833   :  { %2811 = vst [vmem:[#allocation19] sm:$0xff] %v2808_v24 }
 0x834   :  { %2822 = dma.vmem_to_hbm [thread:$0]  %s2818_s5, 128, %s2820_s6, [#allocation4]  }
 0x838   :  { %v2809_v59 = vpop.f32.mrf.mxu0 }
 0x839   :  { %4476 = dma.done.wait [#allocation4], 128  }
 0x83a   :  { %4477 = vsyncadd [#allocation4], 4294967168 }
 0x83b   :  { %2827 = vsyncpa [#allocation3], 1 }
 0x83c   :  { %2828 = vsyncpa [#allocation6], 1 }
 0x83d   :  { %2829 = vsyncpa [#allocation9], 1 }
 0x83e   :  { %2830 = vsyncpa [#allocation12], 1 }
 0x83f   :  { %2831 = vsyncpa [#allocation15], 1 }
 0x840   :  { %2832 = vsyncpa [#allocation18], 1 }
 0x841   :  { %2833 = vsyncpa [#allocation4], 1 }

</bundles_post_ra>
